<compile_context>
chip_gen: v7x
topology: tpu7x:2x2x1
jax: 0.10.0
libtpu: 0.0.40
codegen_flags: <defaults>
</compile_context>

<pallas_src>
import functools
import math

import jax
import jax.numpy as jnp
from jax.experimental import pallas as pl
from jax.experimental.pallas import tpu as pltpu

# ----------------------------- model config --------------------------------
CFG = dict(
    d_model=32,
    n_heads=4,
    d_head=8,
    d_mlp=128,      # 4 * d_model
    n_layers=2,
    d_vocab=64,
    n_ctx=16,
    eps=1e-5,
)

OUT_W = 128  # lane-dense output slab width (> d_vocab, multiple of 128)

# packed per-layer vector buffer: one 128-wide row per small parameter
_VEC_ROWS = 8          # ln1_w, ln1_b, b_QKV, b_O, ln2_w, ln2_b, b_in, b_out
_VEC_W = 128
_FINAL_ROWS = 8        # ln_f_w, ln_f_b, b_cat, vh_W2, vh_b2, pad, pad, pad


# ----------------------------- fused kernel --------------------------------

def _fused_model_kernel(resid_ref, wa_ref, wout_ref, vecs_ref, wcat_ref, fvec_ref,
                        out_ref,
                        *, B, S, n_layers, n_heads, d_head, d_model, d_mlp,
                        d_vocab, eps, out_width):
    D = d_model
    HD = n_heads * d_head            # == D for GPT-2-style configs
    M = B * S
    scale = 1.0 / math.sqrt(d_head)

    # residual stream for the whole batch, resident in VMEM/vregs as (B*S, D)
    resid = resid_ref[...].astype(jnp.float32).reshape(M, D)

    def layernorm(x, w, b):
        mean = jnp.mean(x, axis=-1, keepdims=True)
        c = x - mean
        var = jnp.mean(c * c, axis=-1, keepdims=True)
        return c * jax.lax.rsqrt(var + eps) * w + b

    # causal mask, computed once and reused by every layer/head (broadcast over B)
    qi = jax.lax.broadcasted_iota(jnp.int32, (S, S), 0)
    ki = jax.lax.broadcasted_iota(jnp.int32, (S, S), 1)
    causal = (qi >= ki)[None, :, :]                                 # (1, S, S)
    neg_inf = jnp.float32(-1e30)

    for l in range(n_layers):                                       # static unroll (L=2)
        wa = wa_ref[l]                                              # (D, 3HD + D + Dm)
        vecs = vecs_ref[l]                                          # (8, 128)
        w_qkv = wa[:, 0:3 * HD]                                     # (D, 3HD)
        w_o = wa[:, 3 * HD:3 * HD + D]                              # (HD, D)  (HD == D)
        w_in = wa[:, 3 * HD + D:3 * HD + D + d_mlp]                 # (D, Dm)
        ln1w = vecs[0:1, 0:D]
        ln1b = vecs[1:2, 0:D]
        b_qkv = vecs[2:3, 0:3 * HD]
        b_o = vecs[3:4, 0:D]
        ln2w = vecs[4:5, 0:D]
        ln2b = vecs[5:6, 0:D]
        b_in = vecs[6:7, 0:d_mlp]
        b_out = vecs[7:8, 0:D]

        # ---- attention sub-block ----------------------------------------------
        x = layernorm(resid, ln1w, ln1b)                            # (M, D)
        qkv = jnp.dot(x, w_qkv, preferred_element_type=jnp.float32) + b_qkv
        qkv3 = qkv.reshape(B, S, 3 * HD)                            # (B, S, 3HD)

        z_heads = []
        for h in range(n_heads):                                    # static unroll (H=4)
            lo = h * d_head
            qh = qkv3[:, :, lo:lo + d_head]                         # (B, S, Dh)
            kh = qkv3[:, :, HD + lo:HD + lo + d_head]               # (B, S, Dh)
            vh = qkv3[:, :, 2 * HD + lo:2 * HD + lo + d_head]       # (B, S, Dh)
            s = jnp.einsum('bqd,bkd->bqk', qh, kh,
                           preferred_element_type=jnp.float32) * scale
            s = jnp.where(causal, s, neg_inf)
            s = s - jnp.max(s, axis=-1, keepdims=True)
            p = jnp.exp(s)
            p = p * pl.reciprocal(jnp.sum(p, axis=-1, keepdims=True), approx=True)
            z_heads.append(jnp.einsum('bqk,bkd->bqd', p, vh,
                                      preferred_element_type=jnp.float32))
        # single head-merged output projection per layer
        z = jnp.concatenate(z_heads, axis=-1).reshape(M, HD)        # (M, HD)
        resid = resid + jnp.dot(z, w_o, preferred_element_type=jnp.float32) + b_o

        # ---- MLP sub-block ------------------------------------------------------
        x2 = layernorm(resid, ln2w, ln2b)
        h1 = jnp.dot(x2, w_in, preferred_element_type=jnp.float32) + b_in
        h1 = jax.nn.gelu(h1, approximate=True)                      # GPT-2 "gelu_new"
        resid = resid + jnp.dot(h1, wout_ref[l],
                                preferred_element_type=jnp.float32) + b_out

    # ---- fused ln_final + (unembed | value-head-layer-1) + value head ------------
    lnfw = fvec_ref[0:1, 0:D]
    lnfb = fvec_ref[1:2, 0:D]
    b_cat = fvec_ref[2:3, :]                                        # (1, 4D + V)
    vw2 = fvec_ref[3:4, 0:4 * D]                                    # (1, 4D)
    vb2 = fvec_ref[4:5, 0:1]                                        # (1, 1)

    normed = layernorm(resid, lnfw, lnfb)                           # ln_final.hook_normalized
    cat = jnp.dot(normed, wcat_ref[...],
                  preferred_element_type=jnp.float32) + b_cat       # (M, 4D + V)
    hv = jnp.maximum(cat[:, 0:4 * D], 0.0)                          # value-head hidden
    logits = cat[:, 4 * D:4 * D + d_vocab]                          # (M, V)
    # second value-head linear has out-features 1: broadcast-multiply + lane reduce
    value = jnp.sum(hv * vw2, axis=-1, keepdims=True) + vb2         # (M, 1)

    # lane-dense output slab: [logits | value broadcast] -> one unmasked 128-lane store
    value_slab = jnp.broadcast_to(value, (M, out_width - d_vocab))
    out = jnp.concatenate([logits, value_slab], axis=-1)            # (M, out_width)
    out_ref[...] = out.reshape(B, S, out_width).astype(out_ref.dtype)


# ----------------------------- parameter packing ----------------------------

def pack_params(params):
    """Pack the 20 small parameter arrays into 5 flat f32 buffers (few DMAs)."""
    D, H, Dh = CFG["d_model"], CFG["n_heads"], CFG["d_head"]
    Dm, V = CFG["d_mlp"], CFG["d_vocab"]
    HD = H * Dh
    assert HD == D, "packing assumes n_heads * d_head == d_model (GPT-2 layout)"

    # per-layer matrices that share leading dim D, concatenated along the last axis
    wa = jnp.concatenate([params["W_QKV"], params["W_O"], params["W_in"]], axis=-1)
    w_out = params["W_out"]                                          # (L, Dm, D)

    # per-layer small vectors -> (L, 8, 128), one row per parameter, lane offset 0
    def padto(v, n):
        return jnp.pad(v, ((0, 0), (0, n - v.shape[-1])))
    rows = [params["ln1_w"], params["ln1_b"], params["b_QKV"], params["b_O"],
            params["ln2_w"], params["ln2_b"], params["b_in"], params["b_out"]]
    vecs = jnp.stack([padto(r, _VEC_W) for r in rows], axis=1)       # (L, 8, 128)

    # final stage: [vh_W1 | W_U] fused into one matmul weight (hv slice lane-aligned)
    wcat = jnp.concatenate([params["vh_W1"], params["W_U"]], axis=-1)  # (D, 4D + V)
    b_cat = jnp.concatenate([params["vh_b1"][0], params["b_U"][0]])    # (4D + V,)
    fw = wcat.shape[-1]

    def padrow(v):
        return jnp.pad(v, (0, fw - v.shape[0]))
    fvec = jnp.stack([
        padrow(params["ln_f_w"][0]), padrow(params["ln_f_b"][0]), b_cat,
        padrow(params["vh_W2_row"][0]), padrow(params["vh_b2"][0]),
        jnp.zeros(fw), jnp.zeros(fw), jnp.zeros(fw)], axis=0)          # (8, 4D + V)

    return wa, w_out, vecs, wcat, fvec


# ----------------------------- pallas wrapper --------------------------------

def fused_forward(resid, packed):
    """resid: (B, S, D) f32 -> (B, S, OUT_W) slab: [:, :, :V]=logits, [:, :, V]=value."""
    B, S, D = resid.shape
    V = CFG["d_vocab"]
    assert V < OUT_W, f"d_vocab={V} must be < OUT_W={OUT_W} (value column needed)"

    kernel = functools.partial(
        _fused_model_kernel,
        B=B, S=S,
        n_layers=CFG["n_layers"], n_heads=CFG["n_heads"], d_head=CFG["d_head"],
        d_model=D, d_mlp=CFG["d_mlp"], d_vocab=V, eps=CFG["eps"], out_width=OUT_W)

    # Single invocation (no grid): whole batch processed as one (B*S, D) row block;
    # every array lives fully in VMEM (total parameter + activation footprint ≪ 1 MiB).
    vmem = pl.BlockSpec(memory_space=pltpu.MemorySpace.VMEM)
    inputs = (resid,) + tuple(packed)

    return pl.pallas_call(
        kernel,
        out_shape=jax.ShapeDtypeStruct((B, S, OUT_W), jnp.float32),
        in_specs=[vmem] * len(inputs),
        out_specs=vmem,
        compiler_params=pltpu.CompilerParams(
            vmem_limit_bytes=4 * 1024 * 1024),       # small explicit budget; frees VMEM for XLA
    )(*inputs)


# ----------------------------- parameters ----------------------------------

def init_params(key):
    D, H, Dh = CFG["d_model"], CFG["n_heads"], CFG["d_head"]
    Dm, V, L = CFG["d_mlp"], CFG["d_vocab"], CFG["n_layers"]
    keys = iter(jax.random.split(key, 32))

    def nrm(shape, std=0.02):
        return (std * jax.random.normal(next(keys), shape)).astype(jnp.float32)

    def zeros(*shape):
        return jnp.zeros(shape, jnp.float32)

    def ones(*shape):
        return jnp.ones(shape, jnp.float32)

    vh_W2 = nrm((4 * D, 1))
    return dict(
        W_E=nrm((V, D)),
        W_pos=nrm((CFG["n_ctx"], D)),
        # stacked per-layer weights (leading axis = layer), QKV fused along the last axis
        ln1_w=ones(L, D), ln1_b=zeros(L, D),
        W_QKV=nrm((L, D, 3 * H * Dh)), b_QKV=zeros(L, 3 * H * Dh),
        W_O=nrm((L, H * Dh, D)), b_O=zeros(L, D),
        ln2_w=ones(L, D), ln2_b=zeros(L, D),
        W_in=nrm((L, D, Dm)), b_in=zeros(L, Dm),
        W_out=nrm((L, Dm, D)), b_out=zeros(L, D),
        # ln_final with w=1, b=0 => identical to LayerNormPre's hook_normalized
        ln_f_w=ones(1, D), ln_f_b=zeros(1, D),
        W_U=nrm((D, V)), b_U=zeros(1, V),
        vh_W1=nrm((D, 4 * D)), vh_b1=zeros(1, 4 * D),
        vh_W2_row=vh_W2.reshape(1, 4 * D), vh_b2=zeros(1, 1),
    )


# ----------------------------- forward pass ---------------------------------

def forward(params, tokens):
    B, S = tokens.shape
    V = CFG["d_vocab"]
    # embedding gather + positional embedding (plain-JAX glue, not the hot path)
    resid = params["W_E"][tokens] + params["W_pos"][:S][None, :, :]     # (B, S, D)
    packed = pack_params(params)                                        # 5 flat buffers
    out = fused_forward(resid, packed)                                  # (B, S, OUT_W)
    logits = out[:, :, :V]                                              # (B, S, V)
    value = out[:, :, V]                                                # (B, S)  (squeeze(-1))
    return logits, value


# ----------------------------- pure-JAX reference ---------------------------

def forward_ref(params, tokens):
    D, H, Dh, L = CFG["d_model"], CFG["n_heads"], CFG["d_head"], CFG["n_layers"]
    eps = CFG["eps"]
    B, S = tokens.shape

    def ln(x, w, b):
        m = jnp.mean(x, -1, keepdims=True)
        c = x - m
        v = jnp.mean(c * c, -1, keepdims=True)
        return c * jax.lax.rsqrt(v + eps) * w + b

    resid = params["W_E"][tokens] + params["W_pos"][:S][None, :, :]
    mask = jnp.tril(jnp.ones((S, S), bool))
    for l in range(L):
        x = ln(resid, params["ln1_w"][l], params["ln1_b"][l])
        qkv = x @ params["W_QKV"][l] + params["b_QKV"][l]
        q, k, v = jnp.split(qkv, 3, axis=-1)
        q = q.reshape(B, S, H, Dh).transpose(0, 2, 1, 3)
        k = k.reshape(B, S, H, Dh).transpose(0, 2, 1, 3)
        v = v.reshape(B, S, H, Dh).transpose(0, 2, 1, 3)
        s = jnp.einsum("bhqd,bhkd->bhqk", q, k) / math.sqrt(Dh)
        s = jnp.where(mask, s, -1e30)
        p = jax.nn.softmax(s, axis=-1)
        z = jnp.einsum("bhqk,bhkd->bhqd", p, v).transpose(0, 2, 1, 3).reshape(B, S, H * Dh)
        resid = resid + z @ params["W_O"][l] + params["b_O"][l]
        x2 = ln(resid, params["ln2_w"][l], params["ln2_b"][l])
        h = jax.nn.gelu(x2 @ params["W_in"][l] + params["b_in"][l], approximate=True)
        resid = resid + h @ params["W_out"][l] + params["b_out"][l]
    normed = ln(resid, params["ln_f_w"][0], params["ln_f_b"][0])
    logits = normed @ params["W_U"] + params["b_U"][0]
    hv = jnp.maximum(normed @ params["vh_W1"] + params["vh_b1"][0], 0.0)
    value = jnp.sum(hv * params["vh_W2_row"][0], -1) + params["vh_b2"][0, 0]
    return logits, value


# ----------------------------------- main ------------------------------------

if __name__ == "__main__":
    key = jax.random.PRNGKey(0)
    pkey, tkey = jax.random.split(key)

    params = init_params(pkey)
    B, S = 2, 8
    tokens = jax.random.randint(tkey, (B, S), 0, CFG["d_vocab"], dtype=jnp.int32)

    fwd = jax.jit(forward)
    logits, value = fwd(params, tokens)
    jax.block_until_ready((logits, value))

    assert logits.shape == (B, S, CFG["d_vocab"]), logits.shape
    assert value.shape == (B, S), value.shape
    assert jnp.all(jnp.isfinite(logits)) and jnp.all(jnp.isfinite(value))

    # numerical sanity check vs. pure-JAX reference (approx reciprocal -> loose tol)
    ref_logits, ref_value = forward_ref(params, tokens)
    assert jnp.allclose(logits, ref_logits, atol=1e-3, rtol=1e-2), "logits mismatch"
    assert jnp.allclose(value, ref_value, atol=1e-3, rtol=1e-2), "value mismatch"

    print("KERNEL_OK")
</pallas_src>

<mosaic_0001>
module attributes {stable_mosaic.version = 11 : i64} {
  func.func @_fused_model_kernel(%arg0: memref<2x8x32xf32, #tpu.memory_space<vmem>>, %arg1: memref<2x32x256xf32, #tpu.memory_space<vmem>>, %arg2: memref<2x128x32xf32, #tpu.memory_space<vmem>>, %arg3: memref<2x8x128xf32, #tpu.memory_space<vmem>>, %arg4: memref<32x192xf32, #tpu.memory_space<vmem>>, %arg5: memref<8x192xf32, #tpu.memory_space<vmem>>, %arg6: memref<2x8x128xf32, #tpu.memory_space<vmem>>) attributes {dimension_semantics = [], scalar_prefetch = 0 : i64, scratch_operands = 0 : i64, tpu.core_type = #tpu.core_type<tc>} {
    %c0 = arith.constant 0 : index
    %c0_0 = arith.constant 0 : index
    %c0_1 = arith.constant 0 : index
    %0 = vector.load %arg0[%c0, %c0_0, %c0_1] : memref<2x8x32xf32, #tpu.memory_space<vmem>>, vector<2x8x32xf32>
    %1 = vector.shape_cast %0 : vector<2x8x32xf32> to vector<16x32xf32>
    %2 = tpu.iota {dimensions = array<i32: 0>} : vector<8x8xi32>
    %3 = tpu.iota {dimensions = array<i32: 1>} : vector<8x8xi32>
    %4 = arith.cmpi sge, %2, %3 : vector<8x8xi32>
    %5 = vector.shape_cast %4 : vector<8x8xi1> to vector<1x8x8xi1>
    %c0_2 = arith.constant 0 : index
    %c0_3 = arith.constant 0 : index
    %c0_4 = arith.constant 0 : index
    %6 = vector.load %arg1[%c0_2, %c0_3, %c0_4] : memref<2x32x256xf32, #tpu.memory_space<vmem>>, vector<1x32x256xf32>
    %7 = vector.shape_cast %6 : vector<1x32x256xf32> to vector<32x256xf32>
    %c0_5 = arith.constant 0 : index
    %c0_6 = arith.constant 0 : index
    %c0_7 = arith.constant 0 : index
    %8 = vector.load %arg3[%c0_5, %c0_6, %c0_7] : memref<2x8x128xf32, #tpu.memory_space<vmem>>, vector<1x8x128xf32>
    %9 = vector.shape_cast %8 : vector<1x8x128xf32> to vector<8x128xf32>
    %10 = vector.extract_strided_slice %7 {offsets = [0, 0], sizes = [32, 96], strides = [1, 1]} : vector<32x256xf32> to vector<32x96xf32>
    %11 = vector.extract_strided_slice %7 {offsets = [0, 96], sizes = [32, 32], strides = [1, 1]} : vector<32x256xf32> to vector<32x32xf32>
    %12 = vector.extract_strided_slice %7 {offsets = [0, 128], sizes = [32, 128], strides = [1, 1]} : vector<32x256xf32> to vector<32x128xf32>
    %13 = vector.extract_strided_slice %9 {offsets = [0, 0], sizes = [1, 32], strides = [1, 1]} : vector<8x128xf32> to vector<1x32xf32>
    %14 = vector.extract_strided_slice %9 {offsets = [1, 0], sizes = [1, 32], strides = [1, 1]} : vector<8x128xf32> to vector<1x32xf32>
    %15 = vector.extract_strided_slice %9 {offsets = [2, 0], sizes = [1, 96], strides = [1, 1]} : vector<8x128xf32> to vector<1x96xf32>
    %16 = vector.extract_strided_slice %9 {offsets = [3, 0], sizes = [1, 32], strides = [1, 1]} : vector<8x128xf32> to vector<1x32xf32>
    %17 = vector.extract_strided_slice %9 {offsets = [4, 0], sizes = [1, 32], strides = [1, 1]} : vector<8x128xf32> to vector<1x32xf32>
    %18 = vector.extract_strided_slice %9 {offsets = [5, 0], sizes = [1, 32], strides = [1, 1]} : vector<8x128xf32> to vector<1x32xf32>
    %19 = vector.extract_strided_slice %9 {offsets = [6, 0], sizes = [1, 128], strides = [1, 1]} : vector<8x128xf32> to vector<1x128xf32>
    %20 = vector.extract_strided_slice %9 {offsets = [7, 0], sizes = [1, 32], strides = [1, 1]} : vector<8x128xf32> to vector<1x32xf32>
    %cst = arith.constant dense<0.000000e+00> : vector<16xf32>
    %21 = vector.multi_reduction <add>, %1, %cst [1] : vector<16x32xf32> to vector<16xf32>
    %22 = vector.shape_cast %21 : vector<16xf32> to vector<16x1xf32>
    %cst_8 = arith.constant 3.200000e+01 : f32
    %23 = vector.broadcast %cst_8 : f32 to vector<16x1xf32>
    %24 = arith.divf %22, %23 : vector<16x1xf32>
    %25 = vector.broadcast %24 : vector<16x1xf32> to vector<16x32xf32>
    %26 = arith.subf %1, %25 : vector<16x32xf32>
    %27 = arith.mulf %26, %26 : vector<16x32xf32>
    %cst_9 = arith.constant dense<0.000000e+00> : vector<16xf32>
    %28 = vector.multi_reduction <add>, %27, %cst_9 [1] : vector<16x32xf32> to vector<16xf32>
    %29 = vector.shape_cast %28 : vector<16xf32> to vector<16x1xf32>
    %cst_10 = arith.constant 3.200000e+01 : f32
    %30 = vector.broadcast %cst_10 : f32 to vector<16x1xf32>
    %31 = arith.divf %29, %30 : vector<16x1xf32>
    %cst_11 = arith.constant 9.99999974E-6 : f32
    %32 = vector.broadcast %cst_11 : f32 to vector<16x1xf32>
    %33 = arith.addf %31, %32 : vector<16x1xf32>
    %34 = math.rsqrt %33 : vector<16x1xf32>
    %35 = vector.broadcast %34 : vector<16x1xf32> to vector<16x32xf32>
    %36 = arith.mulf %26, %35 : vector<16x32xf32>
    %37 = vector.broadcast %13 : vector<1x32xf32> to vector<16x32xf32>
    %38 = arith.mulf %36, %37 : vector<16x32xf32>
    %39 = vector.broadcast %14 : vector<1x32xf32> to vector<16x32xf32>
    %40 = arith.addf %38, %39 : vector<16x32xf32>
    %cst_12 = arith.constant dense<0.000000e+00> : vector<16x96xf32>
    %41 = tpu.matmul %40, %10, %cst_12 {dimension_numbers = #tpu.dot_dimension_numbers<[1], [0], [0], [1], [0, 0, 1, 1], [], []>} : vector<16x32xf32>, vector<32x96xf32>, vector<16x96xf32> -> vector<16x96xf32>
    %42 = vector.broadcast %15 : vector<1x96xf32> to vector<16x96xf32>
    %43 = arith.addf %41, %42 : vector<16x96xf32>
    %44 = vector.shape_cast %43 : vector<16x96xf32> to vector<2x8x96xf32>
    %45 = vector.extract_strided_slice %44 {offsets = [0, 0, 0], sizes = [2, 8, 8], strides = [1, 1, 1]} : vector<2x8x96xf32> to vector<2x8x8xf32>
    %46 = vector.extract_strided_slice %44 {offsets = [0, 0, 32], sizes = [2, 8, 8], strides = [1, 1, 1]} : vector<2x8x96xf32> to vector<2x8x8xf32>
    %47 = vector.extract_strided_slice %44 {offsets = [0, 0, 64], sizes = [2, 8, 8], strides = [1, 1, 1]} : vector<2x8x96xf32> to vector<2x8x8xf32>
    "tpu.trace_start"() <{level = 10 : i32, message = "bqd,bkd->bqk"}> : () -> ()
    %cst_13 = arith.constant dense<0.000000e+00> : vector<2x8x8xf32>
    %48 = tpu.matmul %45, %46, %cst_13 {dimension_numbers = #tpu.dot_dimension_numbers<[2], [2], [1], [1], [0, 0, 0, 1, 1, 1], [0], [0]>} : vector<2x8x8xf32>, vector<2x8x8xf32>, vector<2x8x8xf32> -> vector<2x8x8xf32>
    "tpu.trace_stop"() : () -> ()
    %cst_14 = arith.constant 0.353553385 : f32
    %49 = vector.broadcast %cst_14 : f32 to vector<2x8x8xf32>
    %50 = arith.mulf %48, %49 : vector<2x8x8xf32>
    %cst_15 = arith.constant -1.000000e+30 : f32
    %51 = vector.shape_cast %5 : vector<1x8x8xi1> to vector<1x8x8xi1>
    %52 = vector.broadcast %51 : vector<1x8x8xi1> to vector<2x8x8xi1>
    %53 = vector.broadcast %cst_15 : f32 to vector<2x8x8xf32>
    %54 = arith.select %52, %50, %53 : vector<2x8x8xi1>, vector<2x8x8xf32>
    %cst_16 = arith.constant dense<0xFF800000> : vector<2x8xf32>
    %55 = vector.multi_reduction <maximumf>, %54, %cst_16 [2] : vector<2x8x8xf32> to vector<2x8xf32>
    %56 = vector.shape_cast %55 : vector<2x8xf32> to vector<2x8x1xf32>
    %57 = vector.broadcast %56 : vector<2x8x1xf32> to vector<2x8x8xf32>
    %58 = arith.subf %54, %57 : vector<2x8x8xf32>
    %59 = math.exp %58 : vector<2x8x8xf32>
    %cst_17 = arith.constant dense<0.000000e+00> : vector<2x8xf32>
    %60 = vector.multi_reduction <add>, %59, %cst_17 [2] : vector<2x8x8xf32> to vector<2x8xf32>
    %61 = vector.shape_cast %60 : vector<2x8xf32> to vector<2x8x1xf32>
    %62 = tpu.reciprocal %61 {approx = true} : vector<2x8x1xf32> -> vector<2x8x1xf32>
    %63 = vector.broadcast %62 : vector<2x8x1xf32> to vector<2x8x8xf32>
    %64 = arith.mulf %59, %63 : vector<2x8x8xf32>
    "tpu.trace_start"() <{level = 10 : i32, message = "bqk,bkd->bqd"}> : () -> ()
    %cst_18 = arith.constant dense<0.000000e+00> : vector<2x8x8xf32>
    %65 = tpu.matmul %64, %47, %cst_18 {dimension_numbers = #tpu.dot_dimension_numbers<[2], [1], [1], [2], [0, 0, 0, 1, 1, 2], [0], [0]>} : vector<2x8x8xf32>, vector<2x8x8xf32>, vector<2x8x8xf32> -> vector<2x8x8xf32>
    "tpu.trace_stop"() : () -> ()
    %66 = vector.extract_strided_slice %44 {offsets = [0, 0, 8], sizes = [2, 8, 8], strides = [1, 1, 1]} : vector<2x8x96xf32> to vector<2x8x8xf32>
    %67 = vector.extract_strided_slice %44 {offsets = [0, 0, 40], sizes = [2, 8, 8], strides = [1, 1, 1]} : vector<2x8x96xf32> to vector<2x8x8xf32>
    %68 = vector.extract_strided_slice %44 {offsets = [0, 0, 72], sizes = [2, 8, 8], strides = [1, 1, 1]} : vector<2x8x96xf32> to vector<2x8x8xf32>
    "tpu.trace_start"() <{level = 10 : i32, message = "bqd,bkd->bqk"}> : () -> ()
    %cst_19 = arith.constant dense<0.000000e+00> : vector<2x8x8xf32>
    %69 = tpu.matmul %66, %67, %cst_19 {dimension_numbers = #tpu.dot_dimension_numbers<[2], [2], [1], [1], [0, 0, 0, 1, 1, 1], [0], [0]>} : vector<2x8x8xf32>, vector<2x8x8xf32>, vector<2x8x8xf32> -> vector<2x8x8xf32>
    "tpu.trace_stop"() : () -> ()
    %cst_20 = arith.constant 0.353553385 : f32
    %70 = vector.broadcast %cst_20 : f32 to vector<2x8x8xf32>
    %71 = arith.mulf %69, %70 : vector<2x8x8xf32>
    %cst_21 = arith.constant -1.000000e+30 : f32
    %72 = vector.shape_cast %5 : vector<1x8x8xi1> to vector<1x8x8xi1>
    %73 = vector.broadcast %72 : vector<1x8x8xi1> to vector<2x8x8xi1>
    %74 = vector.broadcast %cst_21 : f32 to vector<2x8x8xf32>
    %75 = arith.select %73, %71, %74 : vector<2x8x8xi1>, vector<2x8x8xf32>
    %cst_22 = arith.constant dense<0xFF800000> : vector<2x8xf32>
    %76 = vector.multi_reduction <maximumf>, %75, %cst_22 [2] : vector<2x8x8xf32> to vector<2x8xf32>
    %77 = vector.shape_cast %76 : vector<2x8xf32> to vector<2x8x1xf32>
    %78 = vector.broadcast %77 : vector<2x8x1xf32> to vector<2x8x8xf32>
    %79 = arith.subf %75, %78 : vector<2x8x8xf32>
    %80 = math.exp %79 : vector<2x8x8xf32>
    %cst_23 = arith.constant dense<0.000000e+00> : vector<2x8xf32>
    %81 = vector.multi_reduction <add>, %80, %cst_23 [2] : vector<2x8x8xf32> to vector<2x8xf32>
    %82 = vector.shape_cast %81 : vector<2x8xf32> to vector<2x8x1xf32>
    %83 = tpu.reciprocal %82 {approx = true} : vector<2x8x1xf32> -> vector<2x8x1xf32>
    %84 = vector.broadcast %83 : vector<2x8x1xf32> to vector<2x8x8xf32>
    %85 = arith.mulf %80, %84 : vector<2x8x8xf32>
    "tpu.trace_start"() <{level = 10 : i32, message = "bqk,bkd->bqd"}> : () -> ()
    %cst_24 = arith.constant dense<0.000000e+00> : vector<2x8x8xf32>
    %86 = tpu.matmul %85, %68, %cst_24 {dimension_numbers = #tpu.dot_dimension_numbers<[2], [1], [1], [2], [0, 0, 0, 1, 1, 2], [0], [0]>} : vector<2x8x8xf32>, vector<2x8x8xf32>, vector<2x8x8xf32> -> vector<2x8x8xf32>
    "tpu.trace_stop"() : () -> ()
    %87 = vector.extract_strided_slice %44 {offsets = [0, 0, 16], sizes = [2, 8, 8], strides = [1, 1, 1]} : vector<2x8x96xf32> to vector<2x8x8xf32>
    %88 = vector.extract_strided_slice %44 {offsets = [0, 0, 48], sizes = [2, 8, 8], strides = [1, 1, 1]} : vector<2x8x96xf32> to vector<2x8x8xf32>
    %89 = vector.extract_strided_slice %44 {offsets = [0, 0, 80], sizes = [2, 8, 8], strides = [1, 1, 1]} : vector<2x8x96xf32> to vector<2x8x8xf32>
    "tpu.trace_start"() <{level = 10 : i32, message = "bqd,bkd->bqk"}> : () -> ()
    %cst_25 = arith.constant dense<0.000000e+00> : vector<2x8x8xf32>
    %90 = tpu.matmul %87, %88, %cst_25 {dimension_numbers = #tpu.dot_dimension_numbers<[2], [2], [1], [1], [0, 0, 0, 1, 1, 1], [0], [0]>} : vector<2x8x8xf32>, vector<2x8x8xf32>, vector<2x8x8xf32> -> vector<2x8x8xf32>
    "tpu.trace_stop"() : () -> ()
    %cst_26 = arith.constant 0.353553385 : f32
    %91 = vector.broadcast %cst_26 : f32 to vector<2x8x8xf32>
    %92 = arith.mulf %90, %91 : vector<2x8x8xf32>
    %cst_27 = arith.constant -1.000000e+30 : f32
    %93 = vector.shape_cast %5 : vector<1x8x8xi1> to vector<1x8x8xi1>
    %94 = vector.broadcast %93 : vector<1x8x8xi1> to vector<2x8x8xi1>
    %95 = vector.broadcast %cst_27 : f32 to vector<2x8x8xf32>
    %96 = arith.select %94, %92, %95 : vector<2x8x8xi1>, vector<2x8x8xf32>
    %cst_28 = arith.constant dense<0xFF800000> : vector<2x8xf32>
    %97 = vector.multi_reduction <maximumf>, %96, %cst_28 [2] : vector<2x8x8xf32> to vector<2x8xf32>
    %98 = vector.shape_cast %97 : vector<2x8xf32> to vector<2x8x1xf32>
    %99 = vector.broadcast %98 : vector<2x8x1xf32> to vector<2x8x8xf32>
    %100 = arith.subf %96, %99 : vector<2x8x8xf32>
    %101 = math.exp %100 : vector<2x8x8xf32>
    %cst_29 = arith.constant dense<0.000000e+00> : vector<2x8xf32>
    %102 = vector.multi_reduction <add>, %101, %cst_29 [2] : vector<2x8x8xf32> to vector<2x8xf32>
    %103 = vector.shape_cast %102 : vector<2x8xf32> to vector<2x8x1xf32>
    %104 = tpu.reciprocal %103 {approx = true} : vector<2x8x1xf32> -> vector<2x8x1xf32>
    %105 = vector.broadcast %104 : vector<2x8x1xf32> to vector<2x8x8xf32>
    %106 = arith.mulf %101, %105 : vector<2x8x8xf32>
    "tpu.trace_start"() <{level = 10 : i32, message = "bqk,bkd->bqd"}> : () -> ()
    %cst_30 = arith.constant dense<0.000000e+00> : vector<2x8x8xf32>
    %107 = tpu.matmul %106, %89, %cst_30 {dimension_numbers = #tpu.dot_dimension_numbers<[2], [1], [1], [2], [0, 0, 0, 1, 1, 2], [0], [0]>} : vector<2x8x8xf32>, vector<2x8x8xf32>, vector<2x8x8xf32> -> vector<2x8x8xf32>
    "tpu.trace_stop"() : () -> ()
    %108 = vector.extract_strided_slice %44 {offsets = [0, 0, 24], sizes = [2, 8, 8], strides = [1, 1, 1]} : vector<2x8x96xf32> to vector<2x8x8xf32>
    %109 = vector.extract_strided_slice %44 {offsets = [0, 0, 56], sizes = [2, 8, 8], strides = [1, 1, 1]} : vector<2x8x96xf32> to vector<2x8x8xf32>
    %110 = vector.extract_strided_slice %44 {offsets = [0, 0, 88], sizes = [2, 8, 8], strides = [1, 1, 1]} : vector<2x8x96xf32> to vector<2x8x8xf32>
    "tpu.trace_start"() <{level = 10 : i32, message = "bqd,bkd->bqk"}> : () -> ()
    %cst_31 = arith.constant dense<0.000000e+00> : vector<2x8x8xf32>
    %111 = tpu.matmul %108, %109, %cst_31 {dimension_numbers = #tpu.dot_dimension_numbers<[2], [2], [1], [1], [0, 0, 0, 1, 1, 1], [0], [0]>} : vector<2x8x8xf32>, vector<2x8x8xf32>, vector<2x8x8xf32> -> vector<2x8x8xf32>
    "tpu.trace_stop"() : () -> ()
    %cst_32 = arith.constant 0.353553385 : f32
    %112 = vector.broadcast %cst_32 : f32 to vector<2x8x8xf32>
    %113 = arith.mulf %111, %112 : vector<2x8x8xf32>
    %cst_33 = arith.constant -1.000000e+30 : f32
    %114 = vector.shape_cast %5 : vector<1x8x8xi1> to vector<1x8x8xi1>
    %115 = vector.broadcast %114 : vector<1x8x8xi1> to vector<2x8x8xi1>
    %116 = vector.broadcast %cst_33 : f32 to vector<2x8x8xf32>
    %117 = arith.select %115, %113, %116 : vector<2x8x8xi1>, vector<2x8x8xf32>
    %cst_34 = arith.constant dense<0xFF800000> : vector<2x8xf32>
    %118 = vector.multi_reduction <maximumf>, %117, %cst_34 [2] : vector<2x8x8xf32> to vector<2x8xf32>
    %119 = vector.shape_cast %118 : vector<2x8xf32> to vector<2x8x1xf32>
    %120 = vector.broadcast %119 : vector<2x8x1xf32> to vector<2x8x8xf32>
    %121 = arith.subf %117, %120 : vector<2x8x8xf32>
    %122 = math.exp %121 : vector<2x8x8xf32>
    %cst_35 = arith.constant dense<0.000000e+00> : vector<2x8xf32>
    %123 = vector.multi_reduction <add>, %122, %cst_35 [2] : vector<2x8x8xf32> to vector<2x8xf32>
    %124 = vector.shape_cast %123 : vector<2x8xf32> to vector<2x8x1xf32>
    %125 = tpu.reciprocal %124 {approx = true} : vector<2x8x1xf32> -> vector<2x8x1xf32>
    %126 = vector.broadcast %125 : vector<2x8x1xf32> to vector<2x8x8xf32>
    %127 = arith.mulf %122, %126 : vector<2x8x8xf32>
    "tpu.trace_start"() <{level = 10 : i32, message = "bqk,bkd->bqd"}> : () -> ()
    %cst_36 = arith.constant dense<0.000000e+00> : vector<2x8x8xf32>
    %128 = tpu.matmul %127, %110, %cst_36 {dimension_numbers = #tpu.dot_dimension_numbers<[2], [1], [1], [2], [0, 0, 0, 1, 1, 2], [0], [0]>} : vector<2x8x8xf32>, vector<2x8x8xf32>, vector<2x8x8xf32> -> vector<2x8x8xf32>
    "tpu.trace_stop"() : () -> ()
    %129 = tpu.concatenate %65, %86, %107, %128 in 2 : vector<2x8x8xf32>, vector<2x8x8xf32>, vector<2x8x8xf32>, vector<2x8x8xf32> -> vector<2x8x32xf32>
    %130 = vector.shape_cast %129 : vector<2x8x32xf32> to vector<16x32xf32>
    %cst_37 = arith.constant dense<0.000000e+00> : vector<16x32xf32>
    %131 = tpu.matmul %130, %11, %cst_37 {dimension_numbers = #tpu.dot_dimension_numbers<[1], [0], [0], [1], [0, 0, 1, 1], [], []>} : vector<16x32xf32>, vector<32x32xf32>, vector<16x32xf32> -> vector<16x32xf32>
    %132 = arith.addf %1, %131 : vector<16x32xf32>
    %133 = vector.broadcast %16 : vector<1x32xf32> to vector<16x32xf32>
    %134 = arith.addf %132, %133 : vector<16x32xf32>
    %cst_38 = arith.constant dense<0.000000e+00> : vector<16xf32>
    %135 = vector.multi_reduction <add>, %134, %cst_38 [1] : vector<16x32xf32> to vector<16xf32>
    %136 = vector.shape_cast %135 : vector<16xf32> to vector<16x1xf32>
    %cst_39 = arith.constant 3.200000e+01 : f32
    %137 = vector.broadcast %cst_39 : f32 to vector<16x1xf32>
    %138 = arith.divf %136, %137 : vector<16x1xf32>
    %139 = vector.broadcast %138 : vector<16x1xf32> to vector<16x32xf32>
    %140 = arith.subf %134, %139 : vector<16x32xf32>
    %141 = arith.mulf %140, %140 : vector<16x32xf32>
    %cst_40 = arith.constant dense<0.000000e+00> : vector<16xf32>
    %142 = vector.multi_reduction <add>, %141, %cst_40 [1] : vector<16x32xf32> to vector<16xf32>
    %143 = vector.shape_cast %142 : vector<16xf32> to vector<16x1xf32>
    %cst_41 = arith.constant 3.200000e+01 : f32
    %144 = vector.broadcast %cst_41 : f32 to vector<16x1xf32>
    %145 = arith.divf %143, %144 : vector<16x1xf32>
    %cst_42 = arith.constant 9.99999974E-6 : f32
    %146 = vector.broadcast %cst_42 : f32 to vector<16x1xf32>
    %147 = arith.addf %145, %146 : vector<16x1xf32>
    %148 = math.rsqrt %147 : vector<16x1xf32>
    %149 = vector.broadcast %148 : vector<16x1xf32> to vector<16x32xf32>
    %150 = arith.mulf %140, %149 : vector<16x32xf32>
    %151 = vector.broadcast %17 : vector<1x32xf32> to vector<16x32xf32>
    %152 = arith.mulf %150, %151 : vector<16x32xf32>
    %153 = vector.broadcast %18 : vector<1x32xf32> to vector<16x32xf32>
    %154 = arith.addf %152, %153 : vector<16x32xf32>
    %cst_43 = arith.constant dense<0.000000e+00> : vector<16x128xf32>
    %155 = tpu.matmul %154, %12, %cst_43 {dimension_numbers = #tpu.dot_dimension_numbers<[1], [0], [0], [1], [0, 0, 1, 1], [], []>} : vector<16x32xf32>, vector<32x128xf32>, vector<16x128xf32> -> vector<16x128xf32>
    %156 = vector.broadcast %19 : vector<1x128xf32> to vector<16x128xf32>
    %157 = arith.addf %155, %156 : vector<16x128xf32>
    %158 = arith.mulf %157, %157 : vector<16x128xf32>
    %159 = arith.mulf %157, %158 : vector<16x128xf32>
    %cst_44 = arith.constant 4.471500e-02 : f32
    %160 = vector.broadcast %cst_44 : f32 to vector<16x128xf32>
    %161 = arith.mulf %160, %159 : vector<16x128xf32>
    %162 = arith.addf %157, %161 : vector<16x128xf32>
    %cst_45 = arith.constant 0.797884583 : f32
    %163 = vector.broadcast %cst_45 : f32 to vector<16x128xf32>
    %164 = arith.mulf %163, %162 : vector<16x128xf32>
    %165 = math.tanh %164 : vector<16x128xf32>
    %cst_46 = arith.constant 1.000000e+00 : f32
    %166 = vector.broadcast %cst_46 : f32 to vector<16x128xf32>
    %167 = arith.addf %166, %165 : vector<16x128xf32>
    %cst_47 = arith.constant 5.000000e-01 : f32
    %168 = vector.broadcast %cst_47 : f32 to vector<16x128xf32>
    %169 = arith.mulf %168, %167 : vector<16x128xf32>
    %170 = arith.mulf %157, %169 : vector<16x128xf32>
    %c0_48 = arith.constant 0 : index
    %c0_49 = arith.constant 0 : index
    %c0_50 = arith.constant 0 : index
    %171 = vector.load %arg2[%c0_48, %c0_49, %c0_50] : memref<2x128x32xf32, #tpu.memory_space<vmem>>, vector<1x128x32xf32>
    %172 = vector.shape_cast %171 : vector<1x128x32xf32> to vector<128x32xf32>
    %cst_51 = arith.constant dense<0.000000e+00> : vector<16x32xf32>
    %173 = tpu.matmul %170, %172, %cst_51 {dimension_numbers = #tpu.dot_dimension_numbers<[1], [0], [0], [1], [0, 0, 1, 1], [], []>} : vector<16x128xf32>, vector<128x32xf32>, vector<16x32xf32> -> vector<16x32xf32>
    %174 = arith.addf %134, %173 : vector<16x32xf32>
    %175 = vector.broadcast %20 : vector<1x32xf32> to vector<16x32xf32>
    %176 = arith.addf %174, %175 : vector<16x32xf32>
    %c1 = arith.constant 1 : index
    %c0_52 = arith.constant 0 : index
    %c0_53 = arith.constant 0 : index
    %177 = vector.load %arg1[%c1, %c0_52, %c0_53] : memref<2x32x256xf32, #tpu.memory_space<vmem>>, vector<1x32x256xf32>
    %178 = vector.shape_cast %177 : vector<1x32x256xf32> to vector<32x256xf32>
    %c1_54 = arith.constant 1 : index
    %c0_55 = arith.constant 0 : index
    %c0_56 = arith.constant 0 : index
    %179 = vector.load %arg3[%c1_54, %c0_55, %c0_56] : memref<2x8x128xf32, #tpu.memory_space<vmem>>, vector<1x8x128xf32>
    %180 = vector.shape_cast %179 : vector<1x8x128xf32> to vector<8x128xf32>
    %181 = vector.extract_strided_slice %178 {offsets = [0, 0], sizes = [32, 96], strides = [1, 1]} : vector<32x256xf32> to vector<32x96xf32>
    %182 = vector.extract_strided_slice %178 {offsets = [0, 96], sizes = [32, 32], strides = [1, 1]} : vector<32x256xf32> to vector<32x32xf32>
    %183 = vector.extract_strided_slice %178 {offsets = [0, 128], sizes = [32, 128], strides = [1, 1]} : vector<32x256xf32> to vector<32x128xf32>
    %184 = vector.extract_strided_slice %180 {offsets = [0, 0], sizes = [1, 32], strides = [1, 1]} : vector<8x128xf32> to vector<1x32xf32>
    %185 = vector.extract_strided_slice %180 {offsets = [1, 0], sizes = [1, 32], strides = [1, 1]} : vector<8x128xf32> to vector<1x32xf32>
    %186 = vector.extract_strided_slice %180 {offsets = [2, 0], sizes = [1, 96], strides = [1, 1]} : vector<8x128xf32> to vector<1x96xf32>
    %187 = vector.extract_strided_slice %180 {offsets = [3, 0], sizes = [1, 32], strides = [1, 1]} : vector<8x128xf32> to vector<1x32xf32>
    %188 = vector.extract_strided_slice %180 {offsets = [4, 0], sizes = [1, 32], strides = [1, 1]} : vector<8x128xf32> to vector<1x32xf32>
    %189 = vector.extract_strided_slice %180 {offsets = [5, 0], sizes = [1, 32], strides = [1, 1]} : vector<8x128xf32> to vector<1x32xf32>
    %190 = vector.extract_strided_slice %180 {offsets = [6, 0], sizes = [1, 128], strides = [1, 1]} : vector<8x128xf32> to vector<1x128xf32>
    %191 = vector.extract_strided_slice %180 {offsets = [7, 0], sizes = [1, 32], strides = [1, 1]} : vector<8x128xf32> to vector<1x32xf32>
    %cst_57 = arith.constant dense<0.000000e+00> : vector<16xf32>
    %192 = vector.multi_reduction <add>, %176, %cst_57 [1] : vector<16x32xf32> to vector<16xf32>
    %193 = vector.shape_cast %192 : vector<16xf32> to vector<16x1xf32>
    %cst_58 = arith.constant 3.200000e+01 : f32
    %194 = vector.broadcast %cst_58 : f32 to vector<16x1xf32>
    %195 = arith.divf %193, %194 : vector<16x1xf32>
    %196 = vector.broadcast %195 : vector<16x1xf32> to vector<16x32xf32>
    %197 = arith.subf %176, %196 : vector<16x32xf32>
    %198 = arith.mulf %197, %197 : vector<16x32xf32>
    %cst_59 = arith.constant dense<0.000000e+00> : vector<16xf32>
    %199 = vector.multi_reduction <add>, %198, %cst_59 [1] : vector<16x32xf32> to vector<16xf32>
    %200 = vector.shape_cast %199 : vector<16xf32> to vector<16x1xf32>
    %cst_60 = arith.constant 3.200000e+01 : f32
    %201 = vector.broadcast %cst_60 : f32 to vector<16x1xf32>
    %202 = arith.divf %200, %201 : vector<16x1xf32>
    %cst_61 = arith.constant 9.99999974E-6 : f32
    %203 = vector.broadcast %cst_61 : f32 to vector<16x1xf32>
    %204 = arith.addf %202, %203 : vector<16x1xf32>
    %205 = math.rsqrt %204 : vector<16x1xf32>
    %206 = vector.broadcast %205 : vector<16x1xf32> to vector<16x32xf32>
    %207 = arith.mulf %197, %206 : vector<16x32xf32>
    %208 = vector.broadcast %184 : vector<1x32xf32> to vector<16x32xf32>
    %209 = arith.mulf %207, %208 : vector<16x32xf32>
    %210 = vector.broadcast %185 : vector<1x32xf32> to vector<16x32xf32>
    %211 = arith.addf %209, %210 : vector<16x32xf32>
    %cst_62 = arith.constant dense<0.000000e+00> : vector<16x96xf32>
    %212 = tpu.matmul %211, %181, %cst_62 {dimension_numbers = #tpu.dot_dimension_numbers<[1], [0], [0], [1], [0, 0, 1, 1], [], []>} : vector<16x32xf32>, vector<32x96xf32>, vector<16x96xf32> -> vector<16x96xf32>
    %213 = vector.broadcast %186 : vector<1x96xf32> to vector<16x96xf32>
    %214 = arith.addf %212, %213 : vector<16x96xf32>
    %215 = vector.shape_cast %214 : vector<16x96xf32> to vector<2x8x96xf32>
    %216 = vector.extract_strided_slice %215 {offsets = [0, 0, 0], sizes = [2, 8, 8], strides = [1, 1, 1]} : vector<2x8x96xf32> to vector<2x8x8xf32>
    %217 = vector.extract_strided_slice %215 {offsets = [0, 0, 32], sizes = [2, 8, 8], strides = [1, 1, 1]} : vector<2x8x96xf32> to vector<2x8x8xf32>
    %218 = vector.extract_strided_slice %215 {offsets = [0, 0, 64], sizes = [2, 8, 8], strides = [1, 1, 1]} : vector<2x8x96xf32> to vector<2x8x8xf32>
    "tpu.trace_start"() <{level = 10 : i32, message = "bqd,bkd->bqk"}> : () -> ()
    %cst_63 = arith.constant dense<0.000000e+00> : vector<2x8x8xf32>
    %219 = tpu.matmul %216, %217, %cst_63 {dimension_numbers = #tpu.dot_dimension_numbers<[2], [2], [1], [1], [0, 0, 0, 1, 1, 1], [0], [0]>} : vector<2x8x8xf32>, vector<2x8x8xf32>, vector<2x8x8xf32> -> vector<2x8x8xf32>
    "tpu.trace_stop"() : () -> ()
    %cst_64 = arith.constant 0.353553385 : f32
    %220 = vector.broadcast %cst_64 : f32 to vector<2x8x8xf32>
    %221 = arith.mulf %219, %220 : vector<2x8x8xf32>
    %cst_65 = arith.constant -1.000000e+30 : f32
    %222 = vector.shape_cast %5 : vector<1x8x8xi1> to vector<1x8x8xi1>
    %223 = vector.broadcast %222 : vector<1x8x8xi1> to vector<2x8x8xi1>
    %224 = vector.broadcast %cst_65 : f32 to vector<2x8x8xf32>
    %225 = arith.select %223, %221, %224 : vector<2x8x8xi1>, vector<2x8x8xf32>
    %cst_66 = arith.constant dense<0xFF800000> : vector<2x8xf32>
    %226 = vector.multi_reduction <maximumf>, %225, %cst_66 [2] : vector<2x8x8xf32> to vector<2x8xf32>
    %227 = vector.shape_cast %226 : vector<2x8xf32> to vector<2x8x1xf32>
    %228 = vector.broadcast %227 : vector<2x8x1xf32> to vector<2x8x8xf32>
    %229 = arith.subf %225, %228 : vector<2x8x8xf32>
    %230 = math.exp %229 : vector<2x8x8xf32>
    %cst_67 = arith.constant dense<0.000000e+00> : vector<2x8xf32>
    %231 = vector.multi_reduction <add>, %230, %cst_67 [2] : vector<2x8x8xf32> to vector<2x8xf32>
    %232 = vector.shape_cast %231 : vector<2x8xf32> to vector<2x8x1xf32>
    %233 = tpu.reciprocal %232 {approx = true} : vector<2x8x1xf32> -> vector<2x8x1xf32>
    %234 = vector.broadcast %233 : vector<2x8x1xf32> to vector<2x8x8xf32>
    %235 = arith.mulf %230, %234 : vector<2x8x8xf32>
    "tpu.trace_start"() <{level = 10 : i32, message = "bqk,bkd->bqd"}> : () -> ()
    %cst_68 = arith.constant dense<0.000000e+00> : vector<2x8x8xf32>
    %236 = tpu.matmul %235, %218, %cst_68 {dimension_numbers = #tpu.dot_dimension_numbers<[2], [1], [1], [2], [0, 0, 0, 1, 1, 2], [0], [0]>} : vector<2x8x8xf32>, vector<2x8x8xf32>, vector<2x8x8xf32> -> vector<2x8x8xf32>
    "tpu.trace_stop"() : () -> ()
    %237 = vector.extract_strided_slice %215 {offsets = [0, 0, 8], sizes = [2, 8, 8], strides = [1, 1, 1]} : vector<2x8x96xf32> to vector<2x8x8xf32>
    %238 = vector.extract_strided_slice %215 {offsets = [0, 0, 40], sizes = [2, 8, 8], strides = [1, 1, 1]} : vector<2x8x96xf32> to vector<2x8x8xf32>
    %239 = vector.extract_strided_slice %215 {offsets = [0, 0, 72], sizes = [2, 8, 8], strides = [1, 1, 1]} : vector<2x8x96xf32> to vector<2x8x8xf32>
    "tpu.trace_start"() <{level = 10 : i32, message = "bqd,bkd->bqk"}> : () -> ()
    %cst_69 = arith.constant dense<0.000000e+00> : vector<2x8x8xf32>
    %240 = tpu.matmul %237, %238, %cst_69 {dimension_numbers = #tpu.dot_dimension_numbers<[2], [2], [1], [1], [0, 0, 0, 1, 1, 1], [0], [0]>} : vector<2x8x8xf32>, vector<2x8x8xf32>, vector<2x8x8xf32> -> vector<2x8x8xf32>
    "tpu.trace_stop"() : () -> ()
    %cst_70 = arith.constant 0.353553385 : f32
    %241 = vector.broadcast %cst_70 : f32 to vector<2x8x8xf32>
    %242 = arith.mulf %240, %241 : vector<2x8x8xf32>
    %cst_71 = arith.constant -1.000000e+30 : f32
    %243 = vector.shape_cast %5 : vector<1x8x8xi1> to vector<1x8x8xi1>
    %244 = vector.broadcast %243 : vector<1x8x8xi1> to vector<2x8x8xi1>
    %245 = vector.broadcast %cst_71 : f32 to vector<2x8x8xf32>
    %246 = arith.select %244, %242, %245 : vector<2x8x8xi1>, vector<2x8x8xf32>
    %cst_72 = arith.constant dense<0xFF800000> : vector<2x8xf32>
    %247 = vector.multi_reduction <maximumf>, %246, %cst_72 [2] : vector<2x8x8xf32> to vector<2x8xf32>
    %248 = vector.shape_cast %247 : vector<2x8xf32> to vector<2x8x1xf32>
    %249 = vector.broadcast %248 : vector<2x8x1xf32> to vector<2x8x8xf32>
    %250 = arith.subf %246, %249 : vector<2x8x8xf32>
    %251 = math.exp %250 : vector<2x8x8xf32>
    %cst_73 = arith.constant dense<0.000000e+00> : vector<2x8xf32>
    %252 = vector.multi_reduction <add>, %251, %cst_73 [2] : vector<2x8x8xf32> to vector<2x8xf32>
    %253 = vector.shape_cast %252 : vector<2x8xf32> to vector<2x8x1xf32>
    %254 = tpu.reciprocal %253 {approx = true} : vector<2x8x1xf32> -> vector<2x8x1xf32>
    %255 = vector.broadcast %254 : vector<2x8x1xf32> to vector<2x8x8xf32>
    %256 = arith.mulf %251, %255 : vector<2x8x8xf32>
    "tpu.trace_start"() <{level = 10 : i32, message = "bqk,bkd->bqd"}> : () -> ()
    %cst_74 = arith.constant dense<0.000000e+00> : vector<2x8x8xf32>
    %257 = tpu.matmul %256, %239, %cst_74 {dimension_numbers = #tpu.dot_dimension_numbers<[2], [1], [1], [2], [0, 0, 0, 1, 1, 2], [0], [0]>} : vector<2x8x8xf32>, vector<2x8x8xf32>, vector<2x8x8xf32> -> vector<2x8x8xf32>
    "tpu.trace_stop"() : () -> ()
    %258 = vector.extract_strided_slice %215 {offsets = [0, 0, 16], sizes = [2, 8, 8], strides = [1, 1, 1]} : vector<2x8x96xf32> to vector<2x8x8xf32>
    %259 = vector.extract_strided_slice %215 {offsets = [0, 0, 48], sizes = [2, 8, 8], strides = [1, 1, 1]} : vector<2x8x96xf32> to vector<2x8x8xf32>
    %260 = vector.extract_strided_slice %215 {offsets = [0, 0, 80], sizes = [2, 8, 8], strides = [1, 1, 1]} : vector<2x8x96xf32> to vector<2x8x8xf32>
    "tpu.trace_start"() <{level = 10 : i32, message = "bqd,bkd->bqk"}> : () -> ()
    %cst_75 = arith.constant dense<0.000000e+00> : vector<2x8x8xf32>
    %261 = tpu.matmul %258, %259, %cst_75 {dimension_numbers = #tpu.dot_dimension_numbers<[2], [2], [1], [1], [0, 0, 0, 1, 1, 1], [0], [0]>} : vector<2x8x8xf32>, vector<2x8x8xf32>, vector<2x8x8xf32> -> vector<2x8x8xf32>
    "tpu.trace_stop"() : () -> ()
    %cst_76 = arith.constant 0.353553385 : f32
    %262 = vector.broadcast %cst_76 : f32 to vector<2x8x8xf32>
    %263 = arith.mulf %261, %262 : vector<2x8x8xf32>
    %cst_77 = arith.constant -1.000000e+30 : f32
    %264 = vector.shape_cast %5 : vector<1x8x8xi1> to vector<1x8x8xi1>
    %265 = vector.broadcast %264 : vector<1x8x8xi1> to vector<2x8x8xi1>
    %266 = vector.broadcast %cst_77 : f32 to vector<2x8x8xf32>
    %267 = arith.select %265, %263, %266 : vector<2x8x8xi1>, vector<2x8x8xf32>
    %cst_78 = arith.constant dense<0xFF800000> : vector<2x8xf32>
    %268 = vector.multi_reduction <maximumf>, %267, %cst_78 [2] : vector<2x8x8xf32> to vector<2x8xf32>
    %269 = vector.shape_cast %268 : vector<2x8xf32> to vector<2x8x1xf32>
    %270 = vector.broadcast %269 : vector<2x8x1xf32> to vector<2x8x8xf32>
    %271 = arith.subf %267, %270 : vector<2x8x8xf32>
    %272 = math.exp %271 : vector<2x8x8xf32>
    %cst_79 = arith.constant dense<0.000000e+00> : vector<2x8xf32>
    %273 = vector.multi_reduction <add>, %272, %cst_79 [2] : vector<2x8x8xf32> to vector<2x8xf32>
    %274 = vector.shape_cast %273 : vector<2x8xf32> to vector<2x8x1xf32>
    %275 = tpu.reciprocal %274 {approx = true} : vector<2x8x1xf32> -> vector<2x8x1xf32>
    %276 = vector.broadcast %275 : vector<2x8x1xf32> to vector<2x8x8xf32>
    %277 = arith.mulf %272, %276 : vector<2x8x8xf32>
    "tpu.trace_start"() <{level = 10 : i32, message = "bqk,bkd->bqd"}> : () -> ()
    %cst_80 = arith.constant dense<0.000000e+00> : vector<2x8x8xf32>
    %278 = tpu.matmul %277, %260, %cst_80 {dimension_numbers = #tpu.dot_dimension_numbers<[2], [1], [1], [2], [0, 0, 0, 1, 1, 2], [0], [0]>} : vector<2x8x8xf32>, vector<2x8x8xf32>, vector<2x8x8xf32> -> vector<2x8x8xf32>
    "tpu.trace_stop"() : () -> ()
    %279 = vector.extract_strided_slice %215 {offsets = [0, 0, 24], sizes = [2, 8, 8], strides = [1, 1, 1]} : vector<2x8x96xf32> to vector<2x8x8xf32>
    %280 = vector.extract_strided_slice %215 {offsets = [0, 0, 56], sizes = [2, 8, 8], strides = [1, 1, 1]} : vector<2x8x96xf32> to vector<2x8x8xf32>
    %281 = vector.extract_strided_slice %215 {offsets = [0, 0, 88], sizes = [2, 8, 8], strides = [1, 1, 1]} : vector<2x8x96xf32> to vector<2x8x8xf32>
    "tpu.trace_start"() <{level = 10 : i32, message = "bqd,bkd->bqk"}> : () -> ()
    %cst_81 = arith.constant dense<0.000000e+00> : vector<2x8x8xf32>
    %282 = tpu.matmul %279, %280, %cst_81 {dimension_numbers = #tpu.dot_dimension_numbers<[2], [2], [1], [1], [0, 0, 0, 1, 1, 1], [0], [0]>} : vector<2x8x8xf32>, vector<2x8x8xf32>, vector<2x8x8xf32> -> vector<2x8x8xf32>
    "tpu.trace_stop"() : () -> ()
    %cst_82 = arith.constant 0.353553385 : f32
    %283 = vector.broadcast %cst_82 : f32 to vector<2x8x8xf32>
    %284 = arith.mulf %282, %283 : vector<2x8x8xf32>
    %cst_83 = arith.constant -1.000000e+30 : f32
    %285 = vector.shape_cast %5 : vector<1x8x8xi1> to vector<1x8x8xi1>
    %286 = vector.broadcast %285 : vector<1x8x8xi1> to vector<2x8x8xi1>
    %287 = vector.broadcast %cst_83 : f32 to vector<2x8x8xf32>
    %288 = arith.select %286, %284, %287 : vector<2x8x8xi1>, vector<2x8x8xf32>
    %cst_84 = arith.constant dense<0xFF800000> : vector<2x8xf32>
    %289 = vector.multi_reduction <maximumf>, %288, %cst_84 [2] : vector<2x8x8xf32> to vector<2x8xf32>
    %290 = vector.shape_cast %289 : vector<2x8xf32> to vector<2x8x1xf32>
    %291 = vector.broadcast %290 : vector<2x8x1xf32> to vector<2x8x8xf32>
    %292 = arith.subf %288, %291 : vector<2x8x8xf32>
    %293 = math.exp %292 : vector<2x8x8xf32>
    %cst_85 = arith.constant dense<0.000000e+00> : vector<2x8xf32>
    %294 = vector.multi_reduction <add>, %293, %cst_85 [2] : vector<2x8x8xf32> to vector<2x8xf32>
    %295 = vector.shape_cast %294 : vector<2x8xf32> to vector<2x8x1xf32>
    %296 = tpu.reciprocal %295 {approx = true} : vector<2x8x1xf32> -> vector<2x8x1xf32>
    %297 = vector.broadcast %296 : vector<2x8x1xf32> to vector<2x8x8xf32>
    %298 = arith.mulf %293, %297 : vector<2x8x8xf32>
    "tpu.trace_start"() <{level = 10 : i32, message = "bqk,bkd->bqd"}> : () -> ()
    %cst_86 = arith.constant dense<0.000000e+00> : vector<2x8x8xf32>
    %299 = tpu.matmul %298, %281, %cst_86 {dimension_numbers = #tpu.dot_dimension_numbers<[2], [1], [1], [2], [0, 0, 0, 1, 1, 2], [0], [0]>} : vector<2x8x8xf32>, vector<2x8x8xf32>, vector<2x8x8xf32> -> vector<2x8x8xf32>
    "tpu.trace_stop"() : () -> ()
    %300 = tpu.concatenate %236, %257, %278, %299 in 2 : vector<2x8x8xf32>, vector<2x8x8xf32>, vector<2x8x8xf32>, vector<2x8x8xf32> -> vector<2x8x32xf32>
    %301 = vector.shape_cast %300 : vector<2x8x32xf32> to vector<16x32xf32>
    %cst_87 = arith.constant dense<0.000000e+00> : vector<16x32xf32>
    %302 = tpu.matmul %301, %182, %cst_87 {dimension_numbers = #tpu.dot_dimension_numbers<[1], [0], [0], [1], [0, 0, 1, 1], [], []>} : vector<16x32xf32>, vector<32x32xf32>, vector<16x32xf32> -> vector<16x32xf32>
    %303 = arith.addf %176, %302 : vector<16x32xf32>
    %304 = vector.broadcast %187 : vector<1x32xf32> to vector<16x32xf32>
    %305 = arith.addf %303, %304 : vector<16x32xf32>
    %cst_88 = arith.constant dense<0.000000e+00> : vector<16xf32>
    %306 = vector.multi_reduction <add>, %305, %cst_88 [1] : vector<16x32xf32> to vector<16xf32>
    %307 = vector.shape_cast %306 : vector<16xf32> to vector<16x1xf32>
    %cst_89 = arith.constant 3.200000e+01 : f32
    %308 = vector.broadcast %cst_89 : f32 to vector<16x1xf32>
    %309 = arith.divf %307, %308 : vector<16x1xf32>
    %310 = vector.broadcast %309 : vector<16x1xf32> to vector<16x32xf32>
    %311 = arith.subf %305, %310 : vector<16x32xf32>
    %312 = arith.mulf %311, %311 : vector<16x32xf32>
    %cst_90 = arith.constant dense<0.000000e+00> : vector<16xf32>
    %313 = vector.multi_reduction <add>, %312, %cst_90 [1] : vector<16x32xf32> to vector<16xf32>
    %314 = vector.shape_cast %313 : vector<16xf32> to vector<16x1xf32>
    %cst_91 = arith.constant 3.200000e+01 : f32
    %315 = vector.broadcast %cst_91 : f32 to vector<16x1xf32>
    %316 = arith.divf %314, %315 : vector<16x1xf32>
    %cst_92 = arith.constant 9.99999974E-6 : f32
    %317 = vector.broadcast %cst_92 : f32 to vector<16x1xf32>
    %318 = arith.addf %316, %317 : vector<16x1xf32>
    %319 = math.rsqrt %318 : vector<16x1xf32>
    %320 = vector.broadcast %319 : vector<16x1xf32> to vector<16x32xf32>
    %321 = arith.mulf %311, %320 : vector<16x32xf32>
    %322 = vector.broadcast %188 : vector<1x32xf32> to vector<16x32xf32>
    %323 = arith.mulf %321, %322 : vector<16x32xf32>
    %324 = vector.broadcast %189 : vector<1x32xf32> to vector<16x32xf32>
    %325 = arith.addf %323, %324 : vector<16x32xf32>
    %cst_93 = arith.constant dense<0.000000e+00> : vector<16x128xf32>
    %326 = tpu.matmul %325, %183, %cst_93 {dimension_numbers = #tpu.dot_dimension_numbers<[1], [0], [0], [1], [0, 0, 1, 1], [], []>} : vector<16x32xf32>, vector<32x128xf32>, vector<16x128xf32> -> vector<16x128xf32>
    %327 = vector.broadcast %190 : vector<1x128xf32> to vector<16x128xf32>
    %328 = arith.addf %326, %327 : vector<16x128xf32>
    %329 = arith.mulf %328, %328 : vector<16x128xf32>
    %330 = arith.mulf %328, %329 : vector<16x128xf32>
    %cst_94 = arith.constant 4.471500e-02 : f32
    %331 = vector.broadcast %cst_94 : f32 to vector<16x128xf32>
    %332 = arith.mulf %331, %330 : vector<16x128xf32>
    %333 = arith.addf %328, %332 : vector<16x128xf32>
    %cst_95 = arith.constant 0.797884583 : f32
    %334 = vector.broadcast %cst_95 : f32 to vector<16x128xf32>
    %335 = arith.mulf %334, %333 : vector<16x128xf32>
    %336 = math.tanh %335 : vector<16x128xf32>
    %cst_96 = arith.constant 1.000000e+00 : f32
    %337 = vector.broadcast %cst_96 : f32 to vector<16x128xf32>
    %338 = arith.addf %337, %336 : vector<16x128xf32>
    %cst_97 = arith.constant 5.000000e-01 : f32
    %339 = vector.broadcast %cst_97 : f32 to vector<16x128xf32>
    %340 = arith.mulf %339, %338 : vector<16x128xf32>
    %341 = arith.mulf %328, %340 : vector<16x128xf32>
    %c1_98 = arith.constant 1 : index
    %c0_99 = arith.constant 0 : index
    %c0_100 = arith.constant 0 : index
    %342 = vector.load %arg2[%c1_98, %c0_99, %c0_100] : memref<2x128x32xf32, #tpu.memory_space<vmem>>, vector<1x128x32xf32>
    %343 = vector.shape_cast %342 : vector<1x128x32xf32> to vector<128x32xf32>
    %cst_101 = arith.constant dense<0.000000e+00> : vector<16x32xf32>
    %344 = tpu.matmul %341, %343, %cst_101 {dimension_numbers = #tpu.dot_dimension_numbers<[1], [0], [0], [1], [0, 0, 1, 1], [], []>} : vector<16x128xf32>, vector<128x32xf32>, vector<16x32xf32> -> vector<16x32xf32>
    %345 = arith.addf %305, %344 : vector<16x32xf32>
    %346 = vector.broadcast %191 : vector<1x32xf32> to vector<16x32xf32>
    %347 = arith.addf %345, %346 : vector<16x32xf32>
    %c0_102 = arith.constant 0 : index
    %c0_103 = arith.constant 0 : index
    %348 = vector.load %arg5[%c0_102, %c0_103] : memref<8x192xf32, #tpu.memory_space<vmem>>, vector<1x32xf32>
    %c1_104 = arith.constant 1 : index
    %c0_105 = arith.constant 0 : index
    %349 = vector.load %arg5[%c1_104, %c0_105] : memref<8x192xf32, #tpu.memory_space<vmem>>, vector<1x32xf32>
    %c2 = arith.constant 2 : index
    %c0_106 = arith.constant 0 : index
    %350 = vector.load %arg5[%c2, %c0_106] : memref<8x192xf32, #tpu.memory_space<vmem>>, vector<1x192xf32>
    %c3 = arith.constant 3 : index
    %c0_107 = arith.constant 0 : index
    %351 = vector.load %arg5[%c3, %c0_107] : memref<8x192xf32, #tpu.memory_space<vmem>>, vector<1x128xf32>
    %c4 = arith.constant 4 : index
    %c0_108 = arith.constant 0 : index
    %352 = vector.load %arg5[%c4, %c0_108] : memref<8x192xf32, #tpu.memory_space<vmem>>, vector<1x1xf32>
    %cst_109 = arith.constant dense<0.000000e+00> : vector<16xf32>
    %353 = vector.multi_reduction <add>, %347, %cst_109 [1] : vector<16x32xf32> to vector<16xf32>
    %354 = vector.shape_cast %353 : vector<16xf32> to vector<16x1xf32>
    %cst_110 = arith.constant 3.200000e+01 : f32
    %355 = vector.broadcast %cst_110 : f32 to vector<16x1xf32>
    %356 = arith.divf %354, %355 : vector<16x1xf32>
    %357 = vector.broadcast %356 : vector<16x1xf32> to vector<16x32xf32>
    %358 = arith.subf %347, %357 : vector<16x32xf32>
    %359 = arith.mulf %358, %358 : vector<16x32xf32>
    %cst_111 = arith.constant dense<0.000000e+00> : vector<16xf32>
    %360 = vector.multi_reduction <add>, %359, %cst_111 [1] : vector<16x32xf32> to vector<16xf32>
    %361 = vector.shape_cast %360 : vector<16xf32> to vector<16x1xf32>
    %cst_112 = arith.constant 3.200000e+01 : f32
    %362 = vector.broadcast %cst_112 : f32 to vector<16x1xf32>
    %363 = arith.divf %361, %362 : vector<16x1xf32>
    %cst_113 = arith.constant 9.99999974E-6 : f32
    %364 = vector.broadcast %cst_113 : f32 to vector<16x1xf32>
    %365 = arith.addf %363, %364 : vector<16x1xf32>
    %366 = math.rsqrt %365 : vector<16x1xf32>
    %367 = vector.broadcast %366 : vector<16x1xf32> to vector<16x32xf32>
    %368 = arith.mulf %358, %367 : vector<16x32xf32>
    %369 = vector.broadcast %348 : vector<1x32xf32> to vector<16x32xf32>
    %370 = arith.mulf %368, %369 : vector<16x32xf32>
    %371 = vector.broadcast %349 : vector<1x32xf32> to vector<16x32xf32>
    %372 = arith.addf %370, %371 : vector<16x32xf32>
    %c0_114 = arith.constant 0 : index
    %c0_115 = arith.constant 0 : index
    %373 = vector.load %arg4[%c0_114, %c0_115] : memref<32x192xf32, #tpu.memory_space<vmem>>, vector<32x192xf32>
    %cst_116 = arith.constant dense<0.000000e+00> : vector<16x192xf32>
    %374 = tpu.matmul %372, %373, %cst_116 {dimension_numbers = #tpu.dot_dimension_numbers<[1], [0], [0], [1], [0, 0, 1, 1], [], []>} : vector<16x32xf32>, vector<32x192xf32>, vector<16x192xf32> -> vector<16x192xf32>
    %375 = vector.broadcast %350 : vector<1x192xf32> to vector<16x192xf32>
    %376 = arith.addf %374, %375 : vector<16x192xf32>
    %377 = vector.extract_strided_slice %376 {offsets = [0, 0], sizes = [16, 128], strides = [1, 1]} : vector<16x192xf32> to vector<16x128xf32>
    %cst_117 = arith.constant 0.000000e+00 : f32
    %378 = vector.broadcast %cst_117 : f32 to vector<16x128xf32>
    %379 = arith.maximumf %377, %378 : vector<16x128xf32>
    %380 = vector.extract_strided_slice %376 {offsets = [0, 128], sizes = [16, 64], strides = [1, 1]} : vector<16x192xf32> to vector<16x64xf32>
    %381 = vector.broadcast %351 : vector<1x128xf32> to vector<16x128xf32>
    %382 = arith.mulf %379, %381 : vector<16x128xf32>
    %cst_118 = arith.constant dense<0.000000e+00> : vector<16xf32>
    %383 = vector.multi_reduction <add>, %382, %cst_118 [1] : vector<16x128xf32> to vector<16xf32>
    %384 = vector.shape_cast %383 : vector<16xf32> to vector<16x1xf32>
    %385 = vector.broadcast %352 : vector<1x1xf32> to vector<16x1xf32>
    %386 = arith.addf %384, %385 : vector<16x1xf32>
    %387 = vector.shape_cast %386 : vector<16x1xf32> to vector<16x1xf32>
    %388 = vector.broadcast %387 : vector<16x1xf32> to vector<16x64xf32>
    %389 = tpu.concatenate %380, %388 in 1 : vector<16x64xf32>, vector<16x64xf32> -> vector<16x128xf32>
    %390 = vector.shape_cast %389 : vector<16x128xf32> to vector<2x8x128xf32>
    %c0_119 = arith.constant 0 : index
    %c0_120 = arith.constant 0 : index
    %c0_121 = arith.constant 0 : index
    %391 = vector.load %arg6[%c0_119, %c0_120, %c0_121] : memref<2x8x128xf32, #tpu.memory_space<vmem>>, vector<2x8x128xf32>
    tpu.vector_store %arg6[%c0_119, %c0_120, %c0_121], %390 {strides = array<i32>} : memref<2x8x128xf32, #tpu.memory_space<vmem>>, vector<2x8x128xf32>,
    return
  }
}

</mosaic_0001>

<bundles_post_ra>
// kernel: forward.1
= control target key start
LH: loop header
LB: loop body
LE: loop exit
PB: predicated region body
PF: predicated region fallthrough
CT: control target
= control target key end

     0   :  { %vm39_vm0 = vcmask 261120   ;;  %v25_v23 = vlaneseq  ;;  %v4661_v42 = vmov 0.0   ;;  %vm4662_vm1 = vmmov 0   ;;  %s4663_s10 = smov 96   ;;  %s4664_s11 = smov 64   ;;  %s5458_s0 = inlined_call_operand.vmem [shape: f32[2,8,32], index: 0, kind: input, shape index: {}]   ;;  %s5459_s1 = inlined_call_operand.vmem [shape: f32[2,32,256], index: 1, kind: input, shape index: {}]   ;;  %s5460_s3 = inlined_call_operand.vmem [shape: f32[2,8,128], index: 3, kind: input, shape index: {}]   ;;  %s5461_s2 = inlined_call_operand.vmem [shape: f32[2,128,32], index: 2, kind: input, shape index: {}]   ;;  %s5462_s4 = inlined_call_operand.vmem [shape: f32[32,192], index: 4, kind: input, shape index: {}]   ;;  %s5463_s5 = inlined_call_operand.vmem [shape: f32[8,192], index: 5, kind: input, shape index: {}]   ;;  %s5464_s6 = inlined_call_operand.vmem [shape: f32[2,8,128], index: 6, kind: output, shape index: {}]  }
   0x1   :  { %v4717_v0 = vld [vmem:[%s5458_s0] sm:$0xff]  ;;  %v4722_v1 = vld [vmem:[%s5458_s0 + $0x8] sm:$0xff]  ;;  %v4740_v15 = vld [vmem:[%s5459_s1 + $0x10] sm:$0xff]  ;;  %4134 = vmatprep.subr.mxu0 %v4661_v42  ;;  %4136 = vmatprep.mubr.msk.f32.mxu0 %vm4662_vm1, %v4661_v42  ;;  %vm167_vm2 = vcmask 64512   ;;  %s4665_s12 = smov 88   ;;  %s4666_s13 = smov 120  }
   0x2   :  { %v40_v2 = vsel %vm39_vm0, %v4717_v0, 0.0  ;;  %v43_v3 = vsel %vm39_vm0, %v4722_v1, 0.0  ;;  %v4735_v14 = vld [vmem:[%s5459_s1] sm:$0xff]  ;;  %v4754_v19 = vld [vmem:[%s5459_s1 + $0x30] sm:$0xff]  ;;  %v4758_v27 = vshrl.u32 %v25_v23, 7  ;;  %v28_v51 = vand.u32 127, %v25_v23 }
   0x3   :  { %41 = vadd.xlane.f32.xlu0 %v40_v2  ;;  %v4745_v16 = vld [vmem:[%s5459_s1 + $0x20] sm:$0xff]  ;;  %v4547_v17 = vpack.i.bf16 %v4740_v15, %v4735_v14  ;;  %v4409_v18 = vpack.c.bf16 %v4740_v15, %v4735_v14  ;;  %s4667_s14 = smov 56   ;;  %s4668_s15 = smov 80   ;;  %vm1530_vm4 = vcmask 195584   ;;  %vm1527_vm5 = vcmask 130048  }
   0x4   :  { %v4413_v20 = vpack.c.bf16 %v4754_v19, %v4745_v16  ;;  %v4761_v29 = vsub.s32 0, %v4758_v27  ;;  %v4766_v30 = vld [vmem:[%s5460_s3] sm:$0xff]  ;;  %v4769_v31 = vsub.s32 1, %v4758_v27  ;;  %v81_v43 = vsub.s32 2, %v4758_v27  ;;  %s4669_s16 = smov 112   ;;  %s4670_s17 = smov 48  }
   0x5   :  { %4410 = vmatprep.subr.bf16.mxu1 %v4409_v18  ;;  %vm4808_vm3 = vcmp.ge.s32.totalorder %v4758_v27, %v28_v51  ;;  %s4671_s18 = smov 72   ;;  %s4672_s19 = smov 104   ;;  %vm3880_vm6 = vcmask 523264  }
   0x6   :  { %4412 = vmatpush3.bf16.msra.mxu1 %v4409_v18  ;;  %v70_v32 = vrot.slane %v4766_v30, %v4761_v29  ;;  %v76_v35 = vrot.slane %v4766_v30, %v4769_v31  ;;  %v82_v44 = vrot.slane %v4766_v30, %v81_v43  ;;  %s4673_s20 = smov 40   ;;  %s4674_s21 = smov 32  }
   0x7   :  { %44 = vadd.xlane.f32.xlu0 %v43_v3  ;;  %4414 = vmatprep.subr.bf16.mxu1 %v4413_v20  ;;  %s4675_s22 = smov 8   ;;  %s4676_s23 = smov 16  }
   0x8   :  { %s4677_s24 = smov 24  }
   0xa   :  { %4416 = vmatpush3.bf16.msra.mxu1 %v4413_v20 }
   0xb   :  { %4124 = vmatprep.subr.mxu1 %v4661_v42 }
  0x90   :  { %v42_v4 = vpop.xlane.xlu0 %41 }
  0x91   :  { %v47_v5 = vmul.f32 0.03125, %v42_v4 }
  0x93   :  { %v49_v6 = vsub.f32 %v4717_v0, %v47_v5 }
  0x94   :  { %v45_v7 = vpop.xlane.xlu0 %44 }
  0x95   :  { %v48_v8 = vmul.f32 0.03125, %v45_v7  ;;  %v51_v9 = vmul.f32 %v49_v6, %v49_v6 }
  0x97   :  { %v50_v10 = vsub.f32 %v4722_v1, %v48_v8  ;;  %v53_v11 = vsel %vm39_vm0, %v51_v9, 0.0 }
  0x98   :  { %54 = vadd.xlane.f32.xlu1 %v53_v11 }
  0x99   :  { %v52_v12 = vmul.f32 %v50_v10, %v50_v10 }
  0x9b   :  { %v56_v13 = vsel %vm39_vm0, %v52_v12, 0.0 }
  0x9c   :  { %57 = vadd.xlane.f32.xlu1 %v56_v13 }
 0x125   :  { %v55_v21 = vpop.xlane.xlu1 %54 }
 0x126   :  { %v59_v22 = vmul.f32 0.03125, %v55_v21 }
 0x128   :  { %v61_v24 = vadd.f32 1e-05, %v59_v22 }
 0x129   :  { %v58_v25 = vpop.xlane.xlu1 %57 }
 0x12a   :  { %4569 = vrsqrt.f32 %v61_v24  ;;  %v60_v26 = vmul.f32 0.03125, %v58_v25 }
 0x12c   :  { %v62_v28 = vadd.f32 1e-05, %v60_v26 }
 0x12e   :  { %4571 = vrsqrt.f32 %v62_v28 }
 0x134   :  { %v4570_v33 = vpop.eup %4569 }
 0x135   :  { %v65_v34 = vmul.f32 %v4570_v33, %v49_v6 }
 0x137   :  { %v71_v36 = vmul.f32 %v70_v32, %v65_v34 }
 0x138   :  { %v4572_v37 = vpop.eup %4571 }
 0x139   :  { %v66_v38 = vmul.f32 %v4572_v37, %v50_v10  ;;  %v77_v39 = vadd.f32 %v76_v35, %v71_v36 }
 0x13b   :  { %v72_v40 = vmul.f32 %v70_v32, %v66_v38  ;;  %4121 = vmatprep.mubr.msk.f32.mxu1 %vm39_vm0, %v77_v39 }
 0x13d   :  { %v78_v41 = vadd.f32 %v76_v35, %v72_v40 }
 0x13f   :  { %4122 = vmatmul.mubr.msk.f32.vlgmr.msra.gmra.mrb[0].mxu1 %vm39_vm0, %v78_v41 }
 0x140   :  { %4126 = vmatprep.mubr.msk.f32.mxu1 %vm4662_vm1, %v4661_v42 }
 0x212   :  { %v4123_v45 = vpop.f32.mrb[0].mxu1 }
 0x213   :  { %v4787_v46 = vadd.f32 %v4123_v45, %v82_v44  ;;  %v155_v47 = vpop.f32.mrb[1].mxu1 }
 0x214   :  { %v4789_v48 = vadd.f32 %v155_v47, %v82_v44 }
 0x215   :  { %243 = vrot.lane.b32.xlu1 %v4787_v46, %s4663_s10 }
 0x216   :  { %165 = vrot.lane.b32.xlu0 %v4789_v48, %s4663_s10 }
 0x287   :  { %v244_v50 = vpop.permute.xlu1 %243 }
 0x288   :  { %v166_v49 = vpop.permute.xlu0 %165 }
 0x289   :  { %4125 = vmatpush3.xpose.msk.msra.mxu1 %vm167_vm2, %v166_v49 }
 0x28a   :  { %4129 = vmatprep.subr.mxu1 %v4661_v42 }
 0x28c   :  { %4127 = vmatmul.mubr.msk.f32.vlgmr.msra.gmra.mrb[2].mxu1 %vm167_vm2, %v4789_v48 }
 0x28d   :  { %4130 = vmatpush3.xpose.msk.msra.mxu1 %vm167_vm2, %v244_v50  ;;  %4131 = vmatprep.mubr.msk.f32.mxu1 %vm4662_vm1, %v4661_v42 }
 0x28e   :  { %4139 = vmatprep.subr.mxu1 %v4661_v42 }
 0x290   :  { %4132 = vmatmul.mubr.msk.f32.vlgmr.msra.gmra.mrb[4].mxu1 %vm167_vm2, %v4787_v46 }
 0x291   :  { %4141 = vmatprep.mubr.msk.f32.mxu1 %vm4662_vm1, %v4661_v42 }
 0x35f   :  { %v238_v53 = vpop.f32.mrb[2].mxu1 }
 0x360   :  { %v319_v54 = vmul.f32 0.35355338, %v238_v53  ;;  %v4128_v55 = vpop.f32.mrb[3].mxu1 }
 0x362   :  { %v323_v56 = vsel %vm4808_vm3, %v319_v54, -1e+30 }
 0x363   :  { %v315_v57 = vpop.f32.mrb[4].mxu1  ;;  %v325_v58 = vsel %vm167_vm2, %v323_v56, -inf }
 0x364   :  { %v320_v59 = vmul.f32 0.35355338, %v315_v57  ;;  %326 = vmax.xlane.f32.xlu1 %v325_v58  ;;  %v4133_v60 = vpop.f32.mrb[5].mxu1 }
 0x366   :  { %v324_v61 = vsel %vm4808_vm3, %v320_v59, -1e+30 }
 0x367   :  { %v328_v62 = vsel %vm167_vm2, %v324_v61, -inf }
 0x368   :  { %329 = vmax.xlane.f32.xlu0 %v328_v62 }
 0x375   :  { %423 = vrot.lane.b32.xlu1 %v4787_v46, %s4664_s11 }
 0x379   :  { %501 = vrot.lane.b32.xlu1 %v4789_v48, %s4665_s12 }
 0x37d   :  { %579 = vrot.lane.b32.xlu1 %v4787_v46, %s4665_s12 }
 0x37e   :  { %347 = vrot.lane.b32.xlu0 %v4789_v48, %s4664_s11 }
 0x3f1   :  { %v327_v63 = vpop.xlane.xlu1 %326 }
 0x3f2   :  { %v331_v2 = vsub.f32 %v323_v56, %v327_v63 }
 0x3f4   :  { %v333_v3 = vmul.f32 1.442695, %v331_v2 }
 0x3f5   :  { %v424_v4 = vpop.permute.xlu1 %423  ;;  %v330_v5 = vpop.xlane.xlu0 %329 }
 0x3f6   :  { %4573 = vpow2.f32 %v333_v3  ;;  %v332_v6 = vsub.f32 %v324_v61, %v330_v5  ;;  %4140 = vmatpush3.msra.mxu1 %v424_v4 }
 0x3f7   :  { %4149 = vmatprep.subr.mxu1 %v4661_v42 }
 0x3f8   :  { %v335_v7 = vmul.f32 1.442695, %v332_v6 }
 0x3f9   :  { %v348_v8 = vpop.permute.xlu0 %347  ;;  %v502_v13 = vpop.permute.xlu1 %501 }
 0x3fa   :  { %4575 = vpow2.f32 %v335_v7  ;;  %4135 = vmatpush3.msra.mxu0 %v348_v8 }
 0x3fb   :  { %4144 = vmatprep.subr.mxu0 %v4661_v42 }
 0x3fd   :  { %v580_v18 = vpop.permute.xlu1 %579 }
 0x400   :  { %v4574_v9 = vpop.eup %4573 }
 0x401   :  { %v337_v10 = vsel %vm167_vm2, %v4574_v9, 0.0 }
 0x402   :  { %338 = vadd.xlane.f32.xlu0 %v337_v10 }
 0x404   :  { %v4576_v11 = vpop.eup %4575 }
 0x405   :  { %v340_v12 = vsel %vm167_vm2, %v4576_v11, 0.0 }
 0x406   :  { %341 = vadd.xlane.f32.xlu1 %v340_v12 }
 0x417   :  { %577 = vrot.lane.b32.xlu1 %v4787_v46, %s4666_s13 }
 0x418   :  { %499 = vrot.lane.b32.xlu0 %v4789_v48, %s4666_s13 }
 0x48f   :  { %v339_v20 = vpop.xlane.xlu0 %338 }
 0x490   :  { %4577 = vrcp.f32 %v339_v20 }
 0x493   :  { %v342_v21 = vpop.xlane.xlu1 %341  ;;  %v500_v26 = vpop.permute.xlu0 %499 }
 0x494   :  { %4579 = vrcp.f32 %v342_v21 }
 0x497   :  { %v578_v28 = vpop.permute.xlu1 %577 }
 0x49a   :  { %v4578_v22 = vpop.eup %4577 }
 0x49b   :  { %v345_v23 = vmul.f32 %v4578_v22, %v4574_v9 }
 0x49d   :  { %4137 = vmatmul.mubr.msk.f32.vlgmr.msra.gmra.mrb[0].mxu0 %vm167_vm2, %v345_v23 }
 0x49e   :  { %v4580_v24 = vpop.eup %4579  ;;  %4145 = vmatpush3.xpose.msk.msra.mxu0 %vm167_vm2, %v502_v13  ;;  %4146 = vmatprep.mubr.msk.f32.mxu0 %vm4662_vm1, %v4661_v42 }
 0x49f   :  { %v346_v25 = vmul.f32 %v4580_v24, %v4576_v11  ;;  %4154 = vmatprep.subr.mxu0 %v4661_v42 }
 0x4a1   :  { %4142 = vmatmul.mubr.msk.f32.vlgmr.msra.gmra.mrb[6].mxu1 %vm167_vm2, %v346_v25  ;;  %4147 = vmatmul.mubr.msk.f32.vlgmr.msra.gmra.mrb[2].mxu0 %vm167_vm2, %v500_v26 }
 0x4a2   :  { %4150 = vmatpush3.xpose.msk.msra.mxu1 %vm167_vm2, %v580_v18  ;;  %4151 = vmatprep.mubr.msk.f32.mxu1 %vm4662_vm1, %v4661_v42 }
 0x4a3   :  { %4159 = vmatprep.subr.mxu1 %v4661_v42  ;;  %4156 = vmatprep.mubr.msk.f32.mxu0 %vm4662_vm1, %v4661_v42 }
 0x4a5   :  { %4152 = vmatmul.mubr.msk.f32.vlgmr.msra.gmra.mrb[8].mxu1 %vm167_vm2, %v578_v28 }
 0x4a6   :  { %4161 = vmatprep.mubr.msk.f32.mxu1 %vm4662_vm1, %v4661_v42 }
 0x570   :  { %v4850_v32 = vpop.f32.mrb[0].mxu0 }
 0x571   :  { %v4138_v33 = vpop.f32.mrb[1].mxu0 }
 0x574   :  { %v4852_v34 = vpop.f32.mrb[6].mxu1  ;;  %v573_v35 = vpop.f32.mrb[2].mxu0 }
 0x575   :  { %v655_v36 = vmul.f32 0.35355338, %v573_v35  ;;  %v4143_v37 = vpop.f32.mrb[7].mxu1  ;;  %v4148_v38 = vpop.f32.mrb[3].mxu0 }
 0x577   :  { %v657_v39 = vsel %vm4808_vm3, %v655_v36, -1e+30 }
 0x578   :  { %v651_v40 = vpop.f32.mrb[8].mxu1  ;;  %v659_v41 = vsel %vm167_vm2, %v657_v39, -inf }
 0x579   :  { %v656_v44 = vmul.f32 0.35355338, %v651_v40  ;;  %660 = vmax.xlane.f32.xlu0 %v659_v41  ;;  %v4153_v45 = vpop.f32.mrb[9].mxu1 }
 0x57b   :  { %v658_v47 = vsel %vm4808_vm3, %v656_v44, -1e+30 }
 0x57c   :  { %v662_v49 = vsel %vm167_vm2, %v658_v47, -inf }
 0x57d   :  { %663 = vmax.xlane.f32.xlu1 %v662_v49 }
 0x58e   :  { %757 = vrot.lane.b32.xlu1 %v4787_v46, %s4667_s14 }
 0x58f   :  { %681 = vrot.lane.b32.xlu0 %v4789_v48, %s4667_s14 }
 0x592   :  { %835 = vrot.lane.b32.xlu1 %v4789_v48, %s4668_s15 }
 0x596   :  { %913 = vrot.lane.b32.xlu1 %v4787_v46, %s4668_s15 }
 0x59a   :  { %911 = vrot.lane.b32.xlu1 %v4787_v46, %s4669_s16 }
 0x606   :  { %v661_v50 = vpop.xlane.xlu0 %660 }
 0x607   :  { %v665_v51 = vsub.f32 %v657_v39, %v661_v50 }
 0x609   :  { %v667_v53 = vmul.f32 1.442695, %v665_v51 }
 0x60a   :  { %v682_v54 = vpop.permute.xlu0 %681  ;;  %v664_v55 = vpop.xlane.xlu1 %663 }
 0x60b   :  { %4581 = vpow2.f32 %v667_v53  ;;  %v666_v56 = vsub.f32 %v658_v47, %v664_v55  ;;  %4155 = vmatpush3.msra.mxu0 %v682_v54 }
 0x60c   :  { %4164 = vmatprep.subr.mxu0 %v4661_v42 }
 0x60d   :  { %v669_v57 = vmul.f32 1.442695, %v666_v56 }
 0x60e   :  { %v758_v58 = vpop.permute.xlu1 %757 }
 0x60f   :  { %4583 = vpow2.f32 %v669_v57  ;;  %4160 = vmatpush3.msra.mxu1 %v758_v58 }
 0x610   :  { %4169 = vmatprep.subr.mxu1 %v4661_v42 }
 0x612   :  { %v836_v3 = vpop.permute.xlu1 %835 }
 0x615   :  { %v4582_v59 = vpop.eup %4581 }
 0x616   :  { %v671_v60 = vsel %vm167_vm2, %v4582_v59, 0.0  ;;  %v914_v7 = vpop.permute.xlu1 %913 }
 0x617   :  { %672 = vadd.xlane.f32.xlu0 %v671_v60 }
 0x619   :  { %v4584_v61 = vpop.eup %4583 }
 0x61a   :  { %v674_v62 = vsel %vm167_vm2, %v4584_v61, 0.0  ;;  %v912_v10 = vpop.permute.xlu1 %911 }
 0x61b   :  { %675 = vadd.xlane.f32.xlu0 %v674_v62 }
 0x631   :  { %833 = vrot.lane.b32.xlu0 %v4789_v48, %s4669_s16 }
 0x6a4   :  { %v673_v63 = vpop.xlane.xlu0 %672 }
 0x6a5   :  { %4585 = vrcp.f32 %v673_v63 }
 0x6a8   :  { %v676_v2 = vpop.xlane.xlu0 %675 }
 0x6a9   :  { %4587 = vrcp.f32 %v676_v2 }
 0x6ac   :  { %v834_v9 = vpop.permute.xlu0 %833 }
 0x6af   :  { %v4586_v4 = vpop.eup %4585 }
 0x6b0   :  { %v679_v5 = vmul.f32 %v4586_v4, %v4582_v59 }
 0x6b2   :  { %4157 = vmatmul.mubr.msk.f32.vlgmr.msra.gmra.mrb[4].mxu0 %vm167_vm2, %v679_v5 }
 0x6b3   :  { %v4588_v6 = vpop.eup %4587  ;;  %4165 = vmatpush3.xpose.msk.msra.mxu0 %vm167_vm2, %v836_v3  ;;  %4166 = vmatprep.mubr.msk.f32.mxu0 %vm4662_vm1, %v4661_v42 }
 0x6b4   :  { %v680_v8 = vmul.f32 %v4588_v6, %v4584_v61  ;;  %4174 = vmatprep.subr.mxu0 %v4661_v42 }
 0x6b6   :  { %4162 = vmatmul.mubr.msk.f32.vlgmr.msra.gmra.mrb[10].mxu1 %vm167_vm2, %v680_v8  ;;  %4167 = vmatmul.mubr.msk.f32.vlgmr.msra.gmra.mrb[6].mxu0 %vm167_vm2, %v834_v9 }
 0x6b7   :  { %4170 = vmatpush3.xpose.msk.msra.mxu1 %vm167_vm2, %v914_v7  ;;  %4171 = vmatprep.mubr.msk.f32.mxu1 %vm4662_vm1, %v4661_v42 }
 0x6b8   :  { %4179 = vmatprep.subr.mxu1 %v4661_v42  ;;  %4176 = vmatprep.mubr.msk.f32.mxu0 %vm4662_vm1, %v4661_v42 }
 0x6ba   :  { %4172 = vmatmul.mubr.msk.f32.vlgmr.msra.gmra.mrb[12].mxu1 %vm167_vm2, %v912_v10 }
 0x6bb   :  { %4181 = vmatprep.mubr.msk.f32.mxu1 %vm4662_vm1, %v4661_v42 }
 0x785   :  { %v4892_v11 = vpop.f32.mrb[4].mxu0 }
 0x786   :  { %v4158_v12 = vpop.f32.mrb[5].mxu0 }
 0x789   :  { %v4894_v13 = vpop.f32.mrb[10].mxu1  ;;  %v907_v18 = vpop.f32.mrb[6].mxu0 }
 0x78a   :  { %v989_v20 = vmul.f32 0.35355338, %v907_v18  ;;  %v4163_v21 = vpop.f32.mrb[11].mxu1  ;;  %v4168_v22 = vpop.f32.mrb[7].mxu0 }
 0x78b   :  { %v4552_v22 = vpack.i.bf16 %v4754_v19, %v4745_v16 }
 0x78c   :  { %v991_v23 = vsel %vm4808_vm3, %v989_v20, -1e+30 }
 0x78d   :  { %v985_v24 = vpop.f32.mrb[12].mxu1  ;;  %v993_v25 = vsel %vm167_vm2, %v991_v23, -inf }
 0x78e   :  { %v990_v26 = vmul.f32 0.35355338, %v985_v24  ;;  %994 = vmax.xlane.f32.xlu0 %v993_v25  ;;  %v4173_v28 = vpop.f32.mrb[13].mxu1 }
 0x790   :  { %v992_v33 = vsel %vm4808_vm3, %v990_v26, -1e+30 }
 0x791   :  { %v996_v35 = vsel %vm167_vm2, %v992_v33, -inf }
 0x792   :  { %997 = vmax.xlane.f32.xlu1 %v996_v35 }
 0x7a3   :  { %1091 = vrot.lane.b32.xlu1 %v4787_v46, %s4670_s17 }
 0x7a4   :  { %1015 = vrot.lane.b32.xlu0 %v4789_v48, %s4670_s17 }
 0x7a7   :  { %1169 = vrot.lane.b32.xlu1 %v4789_v48, %s4671_s18 }
 0x7ab   :  { %1247 = vrot.lane.b32.xlu1 %v4787_v46, %s4671_s18 }
 0x7af   :  { %1245 = vrot.lane.b32.xlu1 %v4787_v46, %s4672_s19 }
 0x81b   :  { %v995_v36 = vpop.xlane.xlu0 %994 }
 0x81c   :  { %v999_v37 = vsub.f32 %v991_v23, %v995_v36 }
 0x81e   :  { %v1001_v38 = vmul.f32 1.442695, %v999_v37 }
 0x81f   :  { %v1016_v39 = vpop.permute.xlu0 %1015  ;;  %v998_v40 = vpop.xlane.xlu1 %997 }
 0x820   :  { %4589 = vpow2.f32 %v1001_v38  ;;  %v1000_v41 = vsub.f32 %v992_v33, %v998_v40  ;;  %4175 = vmatpush3.msra.mxu0 %v1016_v39 }
 0x821   :  { %4184 = vmatprep.subr.mxu0 %v4661_v42 }
 0x822   :  { %v1003_v44 = vmul.f32 1.442695, %v1000_v41 }
 0x823   :  { %v1092_v45 = vpop.permute.xlu1 %1091 }
 0x824   :  { %4591 = vpow2.f32 %v1003_v44  ;;  %4180 = vmatpush3.msra.mxu1 %v1092_v45 }
 0x825   :  { %4189 = vmatprep.subr.mxu1 %v4661_v42 }
 0x827   :  { %v1170_v55 = vpop.permute.xlu1 %1169 }
 0x82a   :  { %v4590_v47 = vpop.eup %4589 }
 0x82b   :  { %v1005_v49 = vsel %vm167_vm2, %v4590_v47, 0.0  ;;  %v1248_v59 = vpop.permute.xlu1 %1247 }
 0x82c   :  { %1006 = vadd.xlane.f32.xlu0 %v1005_v49 }
 0x82e   :  { %v4592_v50 = vpop.eup %4591 }
 0x82f   :  { %v1008_v51 = vsel %vm167_vm2, %v4592_v50, 0.0  ;;  %v1246_v62 = vpop.permute.xlu1 %1245 }
 0x830   :  { %1009 = vadd.xlane.f32.xlu0 %v1008_v51 }
 0x846   :  { %1167 = vrot.lane.b32.xlu0 %v4789_v48, %s4672_s19 }
 0x8b9   :  { %v1007_v53 = vpop.xlane.xlu0 %1006 }
 0x8ba   :  { %4593 = vrcp.f32 %v1007_v53 }
 0x8bd   :  { %v1010_v54 = vpop.xlane.xlu0 %1009 }
 0x8be   :  { %4595 = vrcp.f32 %v1010_v54 }
 0x8c1   :  { %v1168_v61 = vpop.permute.xlu0 %1167 }
 0x8c4   :  { %v4594_v56 = vpop.eup %4593 }
 0x8c5   :  { %v1013_v57 = vmul.f32 %v4594_v56, %v4590_v47 }
 0x8c7   :  { %4177 = vmatmul.mubr.msk.f32.vlgmr.msra.gmra.mrb[8].mxu0 %vm167_vm2, %v1013_v57 }
 0x8c8   :  { %v4596_v58 = vpop.eup %4595  ;;  %4185 = vmatpush3.xpose.msk.msra.mxu0 %vm167_vm2, %v1170_v55  ;;  %4186 = vmatprep.mubr.msk.f32.mxu0 %vm4662_vm1, %v4661_v42 }
 0x8c9   :  { %v1014_v60 = vmul.f32 %v4596_v58, %v4592_v50  ;;  %4194 = vmatprep.subr.mxu0 %v4661_v42 }
 0x8cb   :  { %4182 = vmatmul.mubr.msk.f32.vlgmr.msra.gmra.mrb[14].mxu1 %vm167_vm2, %v1014_v60  ;;  %4187 = vmatmul.mubr.msk.f32.vlgmr.msra.gmra.mrb[10].mxu0 %vm167_vm2, %v1168_v61 }
 0x8cc   :  { %4190 = vmatpush3.xpose.msk.msra.mxu1 %vm167_vm2, %v1248_v59  ;;  %4191 = vmatprep.mubr.msk.f32.mxu1 %vm4662_vm1, %v4661_v42 }
 0x8cd   :  { %4199 = vmatprep.subr.mxu1 %v4661_v42  ;;  %4196 = vmatprep.mubr.msk.f32.mxu0 %vm4662_vm1, %v4661_v42 }
 0x8cf   :  { %4192 = vmatmul.mubr.msk.f32.vlgmr.msra.gmra.mrb[16].mxu1 %vm167_vm2, %v1246_v62 }
 0x8d0   :  { %4201 = vmatprep.mubr.msk.f32.mxu1 %vm4662_vm1, %v4661_v42 }
 0x99a   :  { %v1087_v63 = vpop.f32.mrb[8].mxu0 }
 0x99b   :  { %v4178_v2 = vpop.f32.mrb[9].mxu0 }
 0x99e   :  { %v1163_v3 = vpop.f32.mrb[14].mxu1  ;;  %v1241_v4 = vpop.f32.mrb[10].mxu0 }
 0x99f   :  { %v1323_v5 = vmul.f32 0.35355338, %v1241_v4  ;;  %v4183_v6 = vpop.f32.mrb[15].mxu1  ;;  %v4188_v7 = vpop.f32.mrb[11].mxu0 }
 0x9a1   :  { %v1325_v8 = vsel %vm4808_vm3, %v1323_v5, -1e+30 }
 0x9a2   :  { %v1319_v9 = vpop.f32.mrb[16].mxu1  ;;  %v1327_v10 = vsel %vm167_vm2, %v1325_v8, -inf }
 0x9a3   :  { %v1324_v12 = vmul.f32 0.35355338, %v1319_v9  ;;  %1328 = vmax.xlane.f32.xlu0 %v1327_v10  ;;  %v4193_v18 = vpop.f32.mrb[17].mxu1 }
 0x9a5   :  { %v1326_v20 = vsel %vm4808_vm3, %v1324_v12, -1e+30 }
 0x9a6   :  { %v1330_v21 = vsel %vm167_vm2, %v1326_v20, -inf }
 0x9a7   :  { %1331 = vmax.xlane.f32.xlu1 %v1330_v21 }
 0x9b8   :  { %1425 = vrot.lane.b32.xlu1 %v4787_v46, %s4673_s20 }
 0x9bc   :  { %4548 = vrot.lane.b32.xlu1 %v4547_v17, %s4674_s21 }
 0x9c0   :  { %4553 = vrot.lane.b32.xlu1 %v4552_v22, %s4674_s21 }
 0x9c4   :  { %1505 = vrot.lane.b32.xlu1 %v4894_v13, %s4675_s22 }
 0x9c8   :  { %1513 = vrot.lane.b32.xlu1 %v1163_v3, %s4676_s23 }
 0xa30   :  { %v1329_v23 = vpop.xlane.xlu0 %1328 }
 0xa31   :  { %v1333_v46 = vsub.f32 %v1325_v8, %v1329_v23 }
 0xa33   :  { %v1335_v24 = vmul.f32 1.442695, %v1333_v46 }
 0xa34   :  { %v1332_v25 = vpop.xlane.xlu1 %1331 }
 0xa35   :  { %4597 = vpow2.f32 %v1335_v24  ;;  %v1334_v26 = vsub.f32 %v1326_v20, %v1332_v25 }
 0xa37   :  { %v1337_v14 = vmul.f32 1.442695, %v1334_v26 }
 0xa38   :  { %v1426_v15 = vpop.permute.xlu1 %1425 }
 0xa39   :  { %4599 = vpow2.f32 %v1337_v14  ;;  %4200 = vmatpush3.msra.mxu1 %v1426_v15  ;;  %v31_v14 = vld [vmem:[%s5459_s1 + $0x8] sm:$0xff]  ;;  %v33_v15 = vld [vmem:[%s5459_s1 + $0x18] sm:$0xff] }
 0xa3c   :  { %v4549_v33 = vpop.permute.xlu1 %4548 }
 0xa3d   :  { %v4551_v35 = vunpack.i.h.bf16 %v4549_v33  ;;  %v4550_v36 = vunpack.i.l.bf16 %v4549_v33 }
 0xa3f   :  { %v4598_v16 = vpop.eup %4597  ;;  %v4417_v38 = vpack.c.bf16 %v4551_v35, %v4550_v36 }
 0xa40   :  { %v1339_v17 = vsel %vm167_vm2, %v4598_v16, 0.0  ;;  %v4554_v39 = vpop.permute.xlu1 %4553 }
 0xa41   :  { %1340 = vadd.xlane.f32.xlu0 %v1339_v17  ;;  %v4556_v40 = vunpack.i.h.bf16 %v4554_v39  ;;  %v4555_v41 = vunpack.i.l.bf16 %v4554_v39  ;;  %v35_v17 = vld [vmem:[%s5459_s1 + $0x28] sm:$0xff]  ;;  %v1666_v39 = vsub.s32 4, %v4758_v27 }
 0xa43   :  { %v4600_v19 = vpop.eup %4599  ;;  %v4421_v45 = vpack.c.bf16 %v4556_v40, %v4555_v41  ;;  %v1672_v40 = vsub.s32 5, %v4758_v27  ;;  %v1667_v41 = vrot.slane %v4766_v30, %v1666_v39 }
 0xa44   :  { %v1342_v13 = vsel %vm167_vm2, %v4600_v19, 0.0  ;;  %v1506_v56 = vpop.permute.xlu1 %1505 }
 0xa45   :  { %1343 = vadd.xlane.f32.xlu0 %v1342_v13 }
 0xa48   :  { %v1514_v59 = vpop.permute.xlu1 %1513 }
 0xa5b   :  { %1349 = vrot.lane.b32.xlu0 %v4789_v48, %s4673_s20 }
 0xa5f   :  { %1503 = vrot.lane.b32.xlu0 %v4892_v11, %s4675_s22 }
 0xa63   :  { %1511 = vrot.lane.b32.xlu0 %v1087_v63, %s4676_s23  ;;  %v1526_v63 = vsel %vm167_vm2, %v4852_v34, %v1506_v56 }
 0xa64   :  { %v1529_v2 = vsel %vm1527_vm5, %v1526_v63, %v1514_v59  ;;  %v1785_v63 = vld [vmem:[%s5461_s2 + $0x30] sm:$0xff] }
 0xace   :  { %v1341_v28 = vpop.xlane.xlu0 %1340 }
 0xacf   :  { %4601 = vrcp.f32 %v1341_v28 }
 0xad2   :  { %v1344_v37 = vpop.xlane.xlu0 %1343 }
 0xad3   :  { %4603 = vrcp.f32 %v1344_v37 }
 0xad6   :  { %v1350_v44 = vpop.permute.xlu0 %1349 }
 0xad7   :  { %4195 = vmatpush3.msra.mxu0 %v1350_v44 }
 0xad8   :  { %4418 = vmatprep.subr.bf16.mxu0 %v4417_v38 }
 0xad9   :  { %v4602_v48 = vpop.eup %4601 }
 0xada   :  { %v1347_v47 = vmul.f32 %v4602_v48, %v4598_v16  ;;  %v1504_v55 = vpop.permute.xlu0 %1503  ;;  %v4425_v16 = vpack.c.bf16 %v33_v15, %v31_v14 }
 0xadb   :  { %v1525_v58 = vsel %vm167_vm2, %v4850_v32, %v1504_v55  ;;  %v1634_v32 = vsub.s32 3, %v4758_v27  ;;  %v1780_v55 = vld [vmem:[%s5461_s2 + $0x8] sm:$0xff] }
 0xadc   :  { %4197 = vmatmul.mubr.msk.f32.vlgmr.msra.gmra.mrb[12].mxu0 %vm167_vm2, %v1347_v47  ;;  %4426 = vmatprep.subr.bf16.mxu1 %v4425_v16 }
 0xadd   :  { %v4604_v11 = vpop.eup %4603  ;;  %4420 = vmatpush3.bf16.msra.mxu0 %v4417_v38  ;;  %v1635_v5 = vrot.slane %v4766_v30, %v1634_v32 }
 0xade   :  { %v1348_v49 = vmul.f32 %v4604_v11, %v4600_v19  ;;  %4422 = vmatprep.subr.bf16.mxu0 %v4421_v45  ;;  %v1512_v57 = vpop.permute.xlu0 %1511  ;;  %v37_v19 = vld [vmem:[%s5459_s1 + $0x38] sm:$0xff] }
 0xadf   :  { %v1528_v60 = vsel %vm1527_vm5, %v1525_v58, %v1512_v57  ;;  %v4429_v13 = vpack.c.bf16 %v37_v19, %v35_v17  ;;  %v1781_v57 = vld [vmem:[%s5461_s2 + $0x10] sm:$0xff]  ;;  %v1782_v58 = vld [vmem:[%s5461_s2 + $0x18] sm:$0xff] }
 0xae0   :  { %4202 = vmatmul.mubr.msk.f32.vlgmr.msra.gmra.mrb[18].mxu1 %vm167_vm2, %v1348_v49  ;;  %v4437_v59 = vpack.c.bf16 %v1782_v58, %v1781_v57 }
 0xae1   :  { %4424 = vmatpush3.bf16.msra.mxu0 %v4421_v45  ;;  %4428 = vmatpush3.bf16.msra.mxu1 %v4425_v16  ;;  %v1673_v45 = vrot.slane %v4766_v30, %v1672_v40 }
 0xae2   :  { %4430 = vmatprep.subr.bf16.mxu1 %v4429_v13 }
 0xae5   :  { %4432 = vmatpush3.bf16.msra.mxu1 %v4429_v13 }
 0xbaf   :  { %v1421_v50 = vpop.f32.mrb[12].mxu0 }
 0xbb0   :  { %1519 = vrot.lane.b32.xlu0 %v1421_v50, %s4677_s24  ;;  %v4198_v51 = vpop.f32.mrb[13].mxu0 }
 0xbb3   :  { %v1497_v53 = vpop.f32.mrb[18].mxu1 }
 0xbb4   :  { %1521 = vrot.lane.b32.xlu1 %v1497_v53, %s4677_s24  ;;  %v4203_v54 = vpop.f32.mrb[19].mxu1 }
 0xbb5   :  { %v1779_v54 = vld [vmem:[%s5461_s2] sm:$0xff] }
 0xbb6   :  { %v4433_v56 = vpack.c.bf16 %v1780_v55, %v1779_v54 }
 0xbb8   :  { %4434 = vmatprep.subr.bf16.mxu0 %v4433_v56 }
 0xc22   :  { %v1520_v61 = vpop.permute.xlu0 %1519 }
 0xc23   :  { %v1531_v62 = vsel %vm1530_vm4, %v1528_v60, %v1520_v61  ;;  %v1783_v60 = vld [vmem:[%s5461_s2 + $0x20] sm:$0xff]  ;;  %v1784_v61 = vld [vmem:[%s5461_s2 + $0x28] sm:$0xff] }
 0xc24   :  { %4212 = vmatprep.mubr.msk.f32.mxu0 %vm39_vm0, %v1531_v62  ;;  %v4441_v62 = vpack.c.bf16 %v1784_v61, %v1783_v60 }
 0xc26   :  { %v1522_v3 = vpop.permute.xlu1 %1521 }
 0xc27   :  { %v1532_v4 = vsel %vm1530_vm4, %v1529_v2, %v1522_v3  ;;  %v1786_v2 = vld [vmem:[%s5461_s2 + $0x38] sm:$0xff] }
 0xc28   :  { %4213 = vmatmul.mubr.msk.f32.vlgmr.msra.gmra.mrb[14].mxu0 %vm39_vm0, %v1532_v4  ;;  %v4445_v3 = vpack.c.bf16 %v1786_v2, %v1785_v63  ;;  %v1787_v4 = vld [vmem:[%s5461_s2 + $0x40] sm:$0xff] }
 0xc29   :  { %4436 = vmatpush3.bf16.msra.mxu0 %v4433_v56 }
 0xc2a   :  { %4438 = vmatprep.subr.bf16.mxu0 %v4437_v59 }
 0xc2d   :  { %4440 = vmatpush3.bf16.msra.mxu0 %v4437_v59 }
 0xc2e   :  { %4442 = vmatprep.subr.bf16.mxu0 %v4441_v62 }
 0xc31   :  { %4444 = vmatpush3.bf16.msra.mxu0 %v4441_v62 }
 0xc32   :  { %4446 = vmatprep.subr.bf16.mxu0 %v4445_v3 }
 0xc35   :  { %4448 = vmatpush3.bf16.msra.mxu0 %v4445_v3 }
 0xcfb   :  { %v4214_v6 = vpop.f32.mrb[14].mxu0 }
 0xcfc   :  { %v1631_v7 = vadd.f32 %v4214_v6, %v4722_v1  ;;  %v1621_v8 = vpop.f32.mrb[15].mxu0  ;;  %v1789_v6 = vld [vmem:[%s5461_s2 + $0x50] sm:$0xff] }
 0xcfd   :  { %v1630_v9 = vadd.f32 %v1621_v8, %v4717_v0  ;;  %v1790_v8 = vld [vmem:[%s5461_s2 + $0x58] sm:$0xff] }
 0xcfe   :  { %v4979_v34 = vadd.f32 %v1635_v5, %v1631_v7 }
 0xcff   :  { %v4981_v10 = vadd.f32 %v1635_v5, %v1630_v9  ;;  %v1788_v5 = vld [vmem:[%s5461_s2 + $0x48] sm:$0xff]  ;;  %v4453_v9 = vpack.c.bf16 %v1790_v8, %v1789_v6  ;;  %v5094_v6 = vld [vmem:[%s5459_s1 + $0x50] sm:$0xff]  ;;  %v5101_v8 = vld [vmem:[%s5459_s1 + $0x60] sm:$0xff] }
 0xd00   :  { %v1641_v12 = vsel %vm39_vm0, %v4979_v34, 0.0  ;;  %v4449_v7 = vpack.c.bf16 %v1788_v5, %v1787_v4  ;;  %v5089_v5 = vld [vmem:[%s5459_s1 + $0x40] sm:$0xff] }
 0xd01   :  { %1642 = vadd.xlane.f32.xlu1 %v1641_v12  ;;  %v1638_v18 = vsel %vm39_vm0, %v4981_v10, 0.0  ;;  %v1791_v12 = vld [vmem:[%s5461_s2 + $0x60] sm:$0xff] }
 0xd02   :  { %1639 = vadd.xlane.f32.xlu0 %v1638_v18  ;;  %4450 = vmatprep.subr.bf16.mxu0 %v4449_v7  ;;  %v1792_v18 = vld [vmem:[%s5461_s2 + $0x68] sm:$0xff] }
 0xd03   :  { %4452 = vmatpush3.bf16.msra.mxu0 %v4449_v7  ;;  %v4465_v7 = vpack.c.bf16 %v5094_v6, %v5089_v5 }
 0xd04   :  { %4454 = vmatprep.subr.bf16.mxu0 %v4453_v9 }
 0xd05   :  { %4466 = vmatprep.subr.bf16.mxu1 %v4465_v7 }
 0xd07   :  { %4456 = vmatpush3.bf16.msra.mxu0 %v4453_v9  ;;  %v5106_v9 = vld [vmem:[%s5459_s1 + $0x70] sm:$0xff] }
 0xd8e   :  { %v1643_v20 = vpop.xlane.xlu1 %1642 }
 0xd8f   :  { %v1645_v21 = vmul.f32 0.03125, %v1643_v20  ;;  %v1640_v22 = vpop.xlane.xlu0 %1639  ;;  %v4457_v20 = vpack.c.bf16 %v1792_v18, %v1791_v12  ;;  %v4562_v12 = vpack.i.bf16 %v5106_v9, %v5101_v8  ;;  %v4469_v18 = vpack.c.bf16 %v5106_v9, %v5101_v8 }
 0xd90   :  { %v1644_v23 = vmul.f32 0.03125, %v1640_v22  ;;  %v1794_v22 = vld [vmem:[%s5461_s2 + $0x78] sm:$0xff] }
 0xd91   :  { %v1647_v1 = vsub.f32 %v4979_v34, %v1645_v21  ;;  %v1793_v21 = vld [vmem:[%s5461_s2 + $0x70] sm:$0xff]  ;;  %4458 = vmatprep.subr.bf16.mxu0 %v4457_v20 }
 0xd92   :  { %v1646_v0 = vsub.f32 %v4981_v10, %v1644_v23  ;;  %v4461_v23 = vpack.c.bf16 %v1794_v22, %v1793_v21  ;;  %4460 = vmatpush3.bf16.msra.mxu0 %v4457_v20 }
 0xd93   :  { %v1649_v25 = vmul.f32 %v1647_v1, %v1647_v1 }
 0xd94   :  { %v1648_v46 = vmul.f32 %v1646_v0, %v1646_v0  ;;  %4462 = vmatprep.subr.bf16.mxu0 %v4461_v23 }
 0xd95   :  { %v1653_v26 = vsel %vm39_vm0, %v1649_v25, 0.0 }
 0xd96   :  { %v1650_v24 = vsel %vm39_vm0, %v1648_v46, 0.0  ;;  %4464 = vmatpush3.bf16.msra.mxu0 %v4461_v23 }
 0xd97   :  { %1651 = vadd.xlane.f32.xlu0 %v1650_v24  ;;  %4302 = vmatprep.subr.mxu0 %v4661_v42 }
 0xd9b   :  { %1654 = vadd.xlane.f32.xlu0 %v1653_v26 }
 0xe24   :  { %v1652_v28 = vpop.xlane.xlu0 %1651 }
 0xe25   :  { %v1656_v33 = vmul.f32 0.03125, %v1652_v28 }
 0xe27   :  { %v1658_v35 = vadd.f32 1e-05, %v1656_v33 }
 0xe28   :  { %v1655_v36 = vpop.xlane.xlu0 %1654 }
 0xe29   :  { %4605 = vrsqrt.f32 %v1658_v35  ;;  %v1657_v37 = vmul.f32 0.03125, %v1655_v36 }
 0xe2b   :  { %v1659_v38 = vadd.f32 1e-05, %v1657_v37 }
 0xe2d   :  { %4607 = vrsqrt.f32 %v1659_v38 }
 0xe33   :  { %v4606_v44 = vpop.eup %4605 }
 0xe34   :  { %v1662_v48 = vmul.f32 %v4606_v44, %v1646_v0 }
 0xe36   :  { %v1668_v47 = vmul.f32 %v1667_v41, %v1662_v48 }
 0xe37   :  { %v4608_v11 = vpop.eup %4607 }
 0xe38   :  { %v1663_v49 = vmul.f32 %v4608_v11, %v1647_v1  ;;  %v1674_v50 = vadd.f32 %v1673_v45, %v1668_v47  ;;  %v1678_v1 = vsub.s32 6, %v4758_v27 }
 0xe3a   :  { %v1669_v51 = vmul.f32 %v1667_v41, %v1663_v49  ;;  %4223 = vmatprep.mubr.msk.f32.mxu1 %vm39_vm0, %v1674_v50  ;;  %v1679_v0 = vrot.slane %v4766_v30, %v1678_v1  ;;  %v1874_v49 = vsub.s32 7, %v4758_v27 }
 0xe3c   :  { %v1675_v53 = vadd.f32 %v1673_v45, %v1669_v51  ;;  %v1875_v50 = vrot.slane %v4766_v30, %v1874_v49 }
 0xe3e   :  { %4224 = vmatmul.mubr.msk.f32.vlgmr.msra.gmra.mrb[20].mxu1 %vm39_vm0, %v1675_v53 }
 0xe3f   :  { %4468 = vmatpush3.bf16.msra.mxu1 %v4465_v7 }
 0xe40   :  { %4470 = vmatprep.subr.bf16.mxu1 %v4469_v18 }
 0xe43   :  { %4472 = vmatpush3.bf16.msra.mxu1 %v4469_v18 }
 0xe44   :  { %4272 = vmatprep.subr.mxu1 %v4661_v42 }
 0xf11   :  { %v4225_v46 = vpop.f32.mrb[20].mxu1 }
 0xf12   :  { %v1758_v24 = vadd.f32 %v4225_v46, %v1679_v0  ;;  %v1752_v25 = vpop.f32.mrb[21].mxu1 }
 0xf13   :  { %v1753_v26 = vadd.f32 %v1752_v25, %v1679_v0 }
 0xf14   :  { %v1762_v14 = vmul.f32 %v1758_v24, %v1758_v24 }
 0xf15   :  { %v1761_v15 = vmul.f32 %v1753_v26, %v1753_v26 }
 0xf16   :  { %v1764_v16 = vmul.f32 %v1762_v14, %v1758_v24 }
 0xf17   :  { %v1763_v17 = vmul.f32 %v1761_v15, %v1753_v26 }
 0xf18   :  { %v1766_v19 = vmul.f32 0.044715, %v1764_v16 }
 0xf19   :  { %v1765_v13 = vmul.f32 0.044715, %v1763_v17 }
 0xf1a   :  { %v1768_v28 = vadd.f32 %v1766_v19, %v1758_v24 }
 0xf1b   :  { %v1767_v33 = vadd.f32 %v1765_v13, %v1753_v26 }
 0xf1c   :  { %v1770_v35 = vmul.f32 0.7978846, %v1768_v28 }
 0xf1d   :  { %v1769_v36 = vmul.f32 0.7978846, %v1767_v33 }
 0xf1e   :  { %4609 = vtanh.f32 %v1770_v35 }
 0xf1f   :  { %4611 = vtanh.f32 %v1769_v36 }
 0xf28   :  { %v4610_v37 = vpop.eup %4609 }
 0xf29   :  { %v4612_v38 = vpop.eup %4611  ;;  %v1774_v41 = vadd.f32 1.0, %v4610_v37 }
 0xf2a   :  { %v1773_v44 = vadd.f32 1.0, %v4612_v38 }
 0xf2b   :  { %v1776_v48 = vmul.f32 0.5, %v1774_v41 }
 0xf2c   :  { %v1775_v45 = vmul.f32 0.5, %v1773_v44 }
 0xf2d   :  { %v1778_v11 = vmul.f32 %v1776_v48, %v1758_v24  ;;  %v5116_v24 = vld [vmem:[%s5460_s3 + $0x8] sm:$0xff] }
 0xf2e   :  { %v1777_v47 = vmul.f32 %v1775_v45, %v1753_v26  ;;  %v1918_v25 = vrot.slane %v5116_v24, %v4761_v29  ;;  %v1924_v17 = vrot.slane %v5116_v24, %v4769_v31  ;;  %v1930_v35 = vrot.slane %v5116_v24, %v81_v43 }
 0xf30   :  { %4258 = vmatprep.mubr.f32.mxu0 %v1777_v47 }
 0xf31   :  { %4259 = vmatmul.mubr.f32.vlgmr.msra.gmra.mrb[16].mxu0 %v1778_v11 }
 0xf32   :  { %4304 = vmatprep.mubr.msk.f32.mxu0 %vm4662_vm1, %v4661_v42 }
0x1004   :  { %v4260_v51 = vpop.f32.mrb[16].mxu0 }
0x1005   :  { %v1871_v53 = vadd.f32 %v4260_v51, %v4979_v34  ;;  %v1861_v54 = vpop.f32.mrb[17].mxu0 }
0x1006   :  { %v1870_v55 = vadd.f32 %v1861_v54, %v4981_v10 }
0x1007   :  { %v5074_v56 = vadd.f32 %v1875_v50, %v1871_v53 }
0x1008   :  { %v5076_v57 = vadd.f32 %v1875_v50, %v1870_v55 }
0x1009   :  { %v1892_v58 = vsel %vm39_vm0, %v5074_v56, 0.0 }
0x100a   :  { %1893 = vadd.xlane.f32.xlu1 %v1892_v58  ;;  %v1889_v59 = vsel %vm39_vm0, %v5076_v57, 0.0 }
0x100b   :  { %1890 = vadd.xlane.f32.xlu0 %v1889_v59 }
0x1097   :  { %v1894_v60 = vpop.xlane.xlu1 %1893 }
0x1098   :  { %v1896_v30 = vmul.f32 0.03125, %v1894_v60  ;;  %v1891_v61 = vpop.xlane.xlu0 %1890 }
0x1099   :  { %v1895_v62 = vmul.f32 0.03125, %v1891_v61 }
0x109a   :  { %v1898_v34 = vsub.f32 %v5074_v56, %v1896_v30 }
0x109b   :  { %v1897_v10 = vsub.f32 %v5076_v57, %v1895_v62 }
0x109c   :  { %v1900_v63 = vmul.f32 %v1898_v34, %v1898_v34 }
0x109d   :  { %v1899_v2 = vmul.f32 %v1897_v10, %v1897_v10 }
0x109e   :  { %v1904_v3 = vsel %vm39_vm0, %v1900_v63, 0.0 }
0x109f   :  { %1905 = vadd.xlane.f32.xlu1 %v1904_v3  ;;  %v1901_v4 = vsel %vm39_vm0, %v1899_v2, 0.0 }
0x10a0   :  { %1902 = vadd.xlane.f32.xlu0 %v1901_v4 }
0x112c   :  { %v1906_v20 = vpop.xlane.xlu1 %1905 }
0x112d   :  { %v1908_v21 = vmul.f32 0.03125, %v1906_v20  ;;  %v1903_v22 = vpop.xlane.xlu0 %1902 }
0x112e   :  { %v1907_v23 = vmul.f32 0.03125, %v1903_v22 }
0x112f   :  { %v1910_v0 = vadd.f32 1e-05, %v1908_v21 }
0x1130   :  { %v1909_v46 = vadd.f32 1e-05, %v1907_v23 }
0x1131   :  { %4613 = vrsqrt.f32 %v1910_v0 }
0x1132   :  { %4615 = vrsqrt.f32 %v1909_v46 }
0x113b   :  { %v4614_v26 = vpop.eup %4613 }
0x113c   :  { %v4616_v14 = vpop.eup %4615  ;;  %v1914_v15 = vmul.f32 %v4614_v26, %v1898_v34 }
0x113d   :  { %v1913_v16 = vmul.f32 %v4616_v14, %v1897_v10 }
0x113e   :  { %v1920_v19 = vmul.f32 %v1918_v25, %v1914_v15 }
0x113f   :  { %v1919_v13 = vmul.f32 %v1918_v25, %v1913_v16 }
0x1140   :  { %v1926_v33 = vadd.f32 %v1924_v17, %v1920_v19 }
0x1141   :  { %v1925_v28 = vadd.f32 %v1924_v17, %v1919_v13 }
0x1143   :  { %4269 = vmatprep.mubr.msk.f32.mxu1 %vm39_vm0, %v1925_v28 }
0x1144   :  { %4270 = vmatmul.mubr.msk.f32.vlgmr.msra.gmra.mrb[22].mxu1 %vm39_vm0, %v1926_v33 }
0x1145   :  { %4274 = vmatprep.mubr.msk.f32.mxu1 %vm4662_vm1, %v4661_v42 }
0x1217   :  { %v4271_v36 = vpop.f32.mrb[22].mxu1 }
0x1218   :  { %v5129_v37 = vadd.f32 %v4271_v36, %v1930_v35  ;;  %v2003_v38 = vpop.f32.mrb[23].mxu1 }
0x1219   :  { %v5131_v41 = vadd.f32 %v2003_v38, %v1930_v35 }
0x121a   :  { %2090 = vrot.lane.b32.xlu1 %v5129_v37, %s4663_s10 }
0x121b   :  { %2013 = vrot.lane.b32.xlu0 %v5131_v41, %s4663_s10 }
0x128c   :  { %v2091_v48 = vpop.permute.xlu1 %2090 }
0x128d   :  { %v2014_v44 = vpop.permute.xlu0 %2013 }
0x128e   :  { %4273 = vmatpush3.xpose.msk.msra.mxu1 %vm167_vm2, %v2014_v44 }
0x128f   :  { %4277 = vmatprep.subr.mxu1 %v4661_v42 }
0x1291   :  { %4275 = vmatmul.mubr.msk.f32.vlgmr.msra.gmra.mrb[24].mxu1 %vm167_vm2, %v5131_v41 }
0x1292   :  { %4278 = vmatpush3.xpose.msk.msra.mxu1 %vm167_vm2, %v2091_v48  ;;  %4279 = vmatprep.mubr.msk.f32.mxu1 %vm4662_vm1, %v4661_v42 }
0x1293   :  { %4282 = vmatprep.subr.mxu1 %v4661_v42 }
0x1295   :  { %4280 = vmatmul.mubr.msk.f32.vlgmr.msra.gmra.mrb[26].mxu1 %vm167_vm2, %v5129_v37 }
0x1296   :  { %4284 = vmatprep.mubr.msk.f32.mxu1 %vm4662_vm1, %v4661_v42 }
0x1364   :  { %v2085_v43 = vpop.f32.mrb[24].mxu1 }
0x1365   :  { %v2166_v45 = vmul.f32 0.35355338, %v2085_v43  ;;  %v4276_v47 = vpop.f32.mrb[25].mxu1 }
0x1367   :  { %v2168_v11 = vsel %vm4808_vm3, %v2166_v45, -1e+30 }
0x1368   :  { %v2162_v50 = vpop.f32.mrb[26].mxu1  ;;  %v2170_v51 = vsel %vm167_vm2, %v2168_v11, -inf }
0x1369   :  { %v2167_v53 = vmul.f32 0.35355338, %v2162_v50  ;;  %2171 = vmax.xlane.f32.xlu1 %v2170_v51  ;;  %v4281_v54 = vpop.f32.mrb[27].mxu1 }
0x136b   :  { %v2169_v55 = vsel %vm4808_vm3, %v2167_v53, -1e+30 }
0x136c   :  { %v2173_v58 = vsel %vm167_vm2, %v2169_v55, -inf }
0x136d   :  { %2174 = vmax.xlane.f32.xlu0 %v2173_v58 }
0x137a   :  { %2268 = vrot.lane.b32.xlu1 %v5129_v37, %s4664_s11 }
0x137e   :  { %2346 = vrot.lane.b32.xlu1 %v5131_v41, %s4665_s12 }
0x1382   :  { %2344 = vrot.lane.b32.xlu1 %v5131_v41, %s4666_s13 }
0x13f6   :  { %v2172_v59 = vpop.xlane.xlu1 %2171 }
0x13f7   :  { %v2176_v60 = vsub.f32 %v2168_v11, %v2172_v59 }
0x13f9   :  { %v2178_v30 = vmul.f32 1.442695, %v2176_v60 }
0x13fa   :  { %v2175_v61 = vpop.xlane.xlu0 %2174  ;;  %v2269_v4 = vpop.permute.xlu1 %2268 }
0x13fb   :  { %4617 = vpow2.f32 %v2178_v30  ;;  %v2177_v62 = vsub.f32 %v2169_v55, %v2175_v61 }
0x13fd   :  { %v2180_v34 = vmul.f32 1.442695, %v2177_v62 }
0x13fe   :  { %v2347_v7 = vpop.permute.xlu1 %2346 }
0x13ff   :  { %4619 = vpow2.f32 %v2180_v34 }
0x1402   :  { %v2345_v18 = vpop.permute.xlu1 %2344 }
0x1405   :  { %v4618_v10 = vpop.eup %4617 }
0x1406   :  { %v2182_v63 = vsel %vm167_vm2, %v4618_v10, 0.0 }
0x1407   :  { %2183 = vadd.xlane.f32.xlu0 %v2182_v63 }
0x1409   :  { %v4620_v2 = vpop.eup %4619 }
0x140a   :  { %v2185_v3 = vsel %vm167_vm2, %v4620_v2, 0.0 }
0x140b   :  { %2186 = vadd.xlane.f32.xlu1 %v2185_v3 }
0x141c   :  { %2422 = vrot.lane.b32.xlu1 %v5129_v37, %s4666_s13 }
0x141d   :  { %2192 = vrot.lane.b32.xlu0 %v5131_v41, %s4664_s11 }
0x1421   :  { %2424 = vrot.lane.b32.xlu0 %v5129_v37, %s4665_s12 }
0x1494   :  { %v2184_v20 = vpop.xlane.xlu0 %2183 }
0x1495   :  { %4621 = vrcp.f32 %v2184_v20 }
0x1498   :  { %v2187_v21 = vpop.xlane.xlu1 %2186  ;;  %v2193_v22 = vpop.permute.xlu0 %2192 }
0x1499   :  { %4623 = vrcp.f32 %v2187_v21  ;;  %4283 = vmatpush3.msra.mxu1 %v2193_v22 }
0x149a   :  { %4287 = vmatprep.subr.mxu1 %v4661_v42 }
0x149c   :  { %v2425_v26 = vpop.permute.xlu0 %2424  ;;  %v2423_v14 = vpop.permute.xlu1 %2422 }
0x149f   :  { %v4622_v23 = vpop.eup %4621 }
0x14a0   :  { %v2190_v0 = vmul.f32 %v4622_v23, %v4618_v10 }
0x14a2   :  { %4285 = vmatmul.mubr.msk.f32.vlgmr.msra.gmra.mrb[28].mxu1 %vm167_vm2, %v2190_v0 }
0x14a3   :  { %v4624_v46 = vpop.eup %4623  ;;  %4288 = vmatpush3.msra.mxu1 %v2269_v4  ;;  %4289 = vmatprep.mubr.msk.f32.mxu1 %vm4662_vm1, %v4661_v42 }
0x14a4   :  { %v2191_v25 = vmul.f32 %v4624_v46, %v4620_v2  ;;  %4292 = vmatprep.subr.mxu1 %v4661_v42 }
0x14a6   :  { %4290 = vmatmul.mubr.msk.f32.vlgmr.msra.gmra.mrb[30].mxu1 %vm167_vm2, %v2191_v25 }
0x14a7   :  { %4294 = vmatprep.mubr.msk.f32.mxu1 %vm4662_vm1, %v4661_v42 }
0x14aa   :  { %4293 = vmatpush3.xpose.msk.msra.mxu1 %vm167_vm2, %v2347_v7 }
0x14ab   :  { %4297 = vmatprep.subr.mxu1 %v4661_v42 }
0x14ad   :  { %4295 = vmatmul.mubr.msk.f32.vlgmr.msra.gmra.mrb[32].mxu1 %vm167_vm2, %v2345_v18 }
0x14ae   :  { %4298 = vmatpush3.xpose.msk.msra.mxu1 %vm167_vm2, %v2425_v26  ;;  %4299 = vmatprep.mubr.msk.f32.mxu1 %vm4662_vm1, %v4661_v42 }
0x14af   :  { %4307 = vmatprep.subr.mxu1 %v4661_v42 }
0x14b1   :  { %4300 = vmatmul.mubr.msk.f32.vlgmr.msra.gmra.mrb[34].mxu1 %vm167_vm2, %v2423_v14 }
0x14b2   :  { %4309 = vmatprep.mubr.msk.f32.mxu1 %vm4662_vm1, %v4661_v42 }
0x1575   :  { %v5187_v15 = vpop.f32.mrb[28].mxu1 }
0x1576   :  { %v4286_v16 = vpop.f32.mrb[29].mxu1 }
0x1579   :  { %v5189_v17 = vpop.f32.mrb[30].mxu1 }
0x157a   :  { %v4291_v19 = vpop.f32.mrb[31].mxu1 }
0x1580   :  { %v2418_v13 = vpop.f32.mrb[32].mxu1 }
0x1581   :  { %v2500_v28 = vmul.f32 0.35355338, %v2418_v13  ;;  %v4296_v33 = vpop.f32.mrb[33].mxu1 }
0x1583   :  { %v2502_v35 = vsel %vm4808_vm3, %v2500_v28, -1e+30 }
0x1584   :  { %v2496_v36 = vpop.f32.mrb[34].mxu1  ;;  %v2504_v38 = vsel %vm167_vm2, %v2502_v35, -inf }
0x1585   :  { %v2501_v44 = vmul.f32 0.35355338, %v2496_v36  ;;  %2505 = vmax.xlane.f32.xlu0 %v2504_v38  ;;  %v4301_v48 = vpop.f32.mrb[35].mxu1 }
0x1587   :  { %v2503_v43 = vsel %vm4808_vm3, %v2501_v44, -1e+30 }
0x1588   :  { %v2507_v45 = vsel %vm167_vm2, %v2503_v43, -inf }
0x1589   :  { %2508 = vmax.xlane.f32.xlu1 %v2507_v45 }
0x159a   :  { %2602 = vrot.lane.b32.xlu1 %v5129_v37, %s4667_s14 }
0x159b   :  { %2526 = vrot.lane.b32.xlu0 %v5131_v41, %s4667_s14 }
0x159e   :  { %2680 = vrot.lane.b32.xlu1 %v5131_v41, %s4668_s15 }
0x15a2   :  { %2758 = vrot.lane.b32.xlu1 %v5129_v37, %s4668_s15 }
0x15a6   :  { %2756 = vrot.lane.b32.xlu1 %v5129_v37, %s4669_s16 }
0x1612   :  { %v2506_v47 = vpop.xlane.xlu0 %2505 }
0x1613   :  { %v2510_v11 = vsub.f32 %v2502_v35, %v2506_v47 }
0x1615   :  { %v2512_v50 = vmul.f32 1.442695, %v2510_v11 }
0x1616   :  { %v2527_v51 = vpop.permute.xlu0 %2526  ;;  %v2509_v53 = vpop.xlane.xlu1 %2508 }
0x1617   :  { %4625 = vpow2.f32 %v2512_v50  ;;  %v2511_v54 = vsub.f32 %v2503_v43, %v2509_v53  ;;  %4303 = vmatpush3.msra.mxu0 %v2527_v51 }
0x1618   :  { %4312 = vmatprep.subr.mxu0 %v4661_v42 }
0x1619   :  { %v2514_v55 = vmul.f32 1.442695, %v2511_v54 }
0x161a   :  { %v2603_v58 = vpop.permute.xlu1 %2602 }
0x161b   :  { %4627 = vpow2.f32 %v2514_v55  ;;  %4308 = vmatpush3.msra.mxu1 %v2603_v58 }
0x161c   :  { %4317 = vmatprep.subr.mxu1 %v4661_v42 }
0x161e   :  { %v2681_v10 = vpop.permute.xlu1 %2680 }
0x1621   :  { %v4626_v59 = vpop.eup %4625 }
0x1622   :  { %v2516_v60 = vsel %vm167_vm2, %v4626_v59, 0.0  ;;  %v2759_v4 = vpop.permute.xlu1 %2758 }
0x1623   :  { %2517 = vadd.xlane.f32.xlu0 %v2516_v60 }
0x1625   :  { %v4628_v30 = vpop.eup %4627 }
0x1626   :  { %v2519_v61 = vsel %vm167_vm2, %v4628_v30, 0.0  ;;  %v2757_v20 = vpop.permute.xlu1 %2756 }
0x1627   :  { %2520 = vadd.xlane.f32.xlu0 %v2519_v61 }
0x163d   :  { %2678 = vrot.lane.b32.xlu0 %v5131_v41, %s4669_s16 }
0x16b0   :  { %v2518_v62 = vpop.xlane.xlu0 %2517 }
0x16b1   :  { %4629 = vrcp.f32 %v2518_v62 }
0x16b4   :  { %v2521_v34 = vpop.xlane.xlu0 %2520 }
0x16b5   :  { %4631 = vrcp.f32 %v2521_v34 }
0x16b8   :  { %v2679_v18 = vpop.permute.xlu0 %2678 }
0x16bb   :  { %v4630_v63 = vpop.eup %4629 }
0x16bc   :  { %v2524_v2 = vmul.f32 %v4630_v63, %v4626_v59 }
0x16be   :  { %4305 = vmatmul.mubr.msk.f32.vlgmr.msra.gmra.mrb[18].mxu0 %vm167_vm2, %v2524_v2 }
0x16bf   :  { %v4632_v3 = vpop.eup %4631  ;;  %4313 = vmatpush3.xpose.msk.msra.mxu0 %vm167_vm2, %v2681_v10  ;;  %4314 = vmatprep.mubr.msk.f32.mxu0 %vm4662_vm1, %v4661_v42 }
0x16c0   :  { %v2525_v7 = vmul.f32 %v4632_v3, %v4628_v30  ;;  %4322 = vmatprep.subr.mxu0 %v4661_v42 }
0x16c2   :  { %4310 = vmatmul.mubr.msk.f32.vlgmr.msra.gmra.mrb[36].mxu1 %vm167_vm2, %v2525_v7  ;;  %4315 = vmatmul.mubr.msk.f32.vlgmr.msra.gmra.mrb[20].mxu0 %vm167_vm2, %v2679_v18 }
0x16c3   :  { %4318 = vmatpush3.xpose.msk.msra.mxu1 %vm167_vm2, %v2759_v4  ;;  %4319 = vmatprep.mubr.msk.f32.mxu1 %vm4662_vm1, %v4661_v42 }
0x16c4   :  { %4327 = vmatprep.subr.mxu1 %v4661_v42  ;;  %4324 = vmatprep.mubr.msk.f32.mxu0 %vm4662_vm1, %v4661_v42 }
0x16c6   :  { %4320 = vmatmul.mubr.msk.f32.vlgmr.msra.gmra.mrb[38].mxu1 %vm167_vm2, %v2757_v20 }
0x16c7   :  { %4329 = vmatprep.mubr.msk.f32.mxu1 %vm4662_vm1, %v4661_v42 }
0x1791   :  { %v5229_v21 = vpop.f32.mrb[18].mxu0 }
0x1792   :  { %v4306_v22 = vpop.f32.mrb[19].mxu0 }
0x1795   :  { %v5231_v23 = vpop.f32.mrb[36].mxu1  ;;  %v2752_v0 = vpop.f32.mrb[20].mxu0 }
0x1796   :  { %v2834_v46 = vmul.f32 0.35355338, %v2752_v0  ;;  %v4311_v25 = vpop.f32.mrb[37].mxu1  ;;  %v4316_v26 = vpop.f32.mrb[21].mxu0 }
0x1798   :  { %v2836_v14 = vsel %vm4808_vm3, %v2834_v46, -1e+30 }
0x1799   :  { %v2830_v16 = vpop.f32.mrb[38].mxu1  ;;  %v2838_v19 = vsel %vm167_vm2, %v2836_v14, -inf }
0x179a   :  { %v2835_v13 = vmul.f32 0.35355338, %v2830_v16  ;;  %2839 = vmax.xlane.f32.xlu0 %v2838_v19  ;;  %v4321_v28 = vpop.f32.mrb[39].mxu1 }
0x179c   :  { %v2837_v33 = vsel %vm4808_vm3, %v2835_v13, -1e+30  ;;  %v4557_v13 = vpack.i.bf16 %v5094_v6, %v5089_v5 }
0x179d   :  { %v2841_v35 = vsel %vm167_vm2, %v2837_v33, -inf }
0x179e   :  { %2842 = vmax.xlane.f32.xlu1 %v2841_v35 }
0x17af   :  { %2936 = vrot.lane.b32.xlu1 %v5129_v37, %s4670_s17 }
0x17b0   :  { %2860 = vrot.lane.b32.xlu0 %v5131_v41, %s4670_s17 }
0x17b3   :  { %3014 = vrot.lane.b32.xlu1 %v5131_v41, %s4671_s18 }
0x17b7   :  { %3092 = vrot.lane.b32.xlu1 %v5129_v37, %s4671_s18 }
0x17bb   :  { %3090 = vrot.lane.b32.xlu1 %v5129_v37, %s4672_s19 }
0x1827   :  { %v2840_v36 = vpop.xlane.xlu0 %2839 }
0x1828   :  { %v2844_v38 = vsub.f32 %v2836_v14, %v2840_v36 }
0x182a   :  { %v2846_v44 = vmul.f32 1.442695, %v2844_v38 }
0x182b   :  { %v2861_v48 = vpop.permute.xlu0 %2860  ;;  %v2843_v43 = vpop.xlane.xlu1 %2842 }
0x182c   :  { %4633 = vpow2.f32 %v2846_v44  ;;  %v2845_v45 = vsub.f32 %v2837_v33, %v2843_v43  ;;  %4323 = vmatpush3.msra.mxu0 %v2861_v48 }
0x182d   :  { %4332 = vmatprep.subr.mxu0 %v4661_v42 }
0x182e   :  { %v2848_v47 = vmul.f32 1.442695, %v2845_v45 }
0x182f   :  { %v2937_v11 = vpop.permute.xlu1 %2936 }
0x1830   :  { %4635 = vpow2.f32 %v2848_v47  ;;  %4328 = vmatpush3.msra.mxu1 %v2937_v11 }
0x1831   :  { %4337 = vmatprep.subr.mxu1 %v4661_v42 }
0x1833   :  { %v3015_v59 = vpop.permute.xlu1 %3014 }
0x1836   :  { %v4634_v50 = vpop.eup %4633 }
0x1837   :  { %v2850_v51 = vsel %vm167_vm2, %v4634_v50, 0.0  ;;  %v3093_v62 = vpop.permute.xlu1 %3092 }
0x1838   :  { %2851 = vadd.xlane.f32.xlu0 %v2850_v51 }
0x183a   :  { %v4636_v53 = vpop.eup %4635 }
0x183b   :  { %v2853_v54 = vsel %vm167_vm2, %v4636_v53, 0.0  ;;  %v3091_v63 = vpop.permute.xlu1 %3090 }
0x183c   :  { %2854 = vadd.xlane.f32.xlu0 %v2853_v54 }
0x1852   :  { %3012 = vrot.lane.b32.xlu0 %v5131_v41, %s4672_s19 }
0x18c5   :  { %v2852_v55 = vpop.xlane.xlu0 %2851 }
0x18c6   :  { %4637 = vrcp.f32 %v2852_v55 }
0x18c9   :  { %v2855_v58 = vpop.xlane.xlu0 %2854 }
0x18ca   :  { %4639 = vrcp.f32 %v2855_v58 }
0x18cd   :  { %v3013_v10 = vpop.permute.xlu0 %3012 }
0x18d0   :  { %v4638_v60 = vpop.eup %4637 }
0x18d1   :  { %v2858_v30 = vmul.f32 %v4638_v60, %v4634_v50 }
0x18d3   :  { %4325 = vmatmul.mubr.msk.f32.vlgmr.msra.gmra.mrb[22].mxu0 %vm167_vm2, %v2858_v30 }
0x18d4   :  { %v4640_v61 = vpop.eup %4639  ;;  %4333 = vmatpush3.xpose.msk.msra.mxu0 %vm167_vm2, %v3015_v59  ;;  %4334 = vmatprep.mubr.msk.f32.mxu0 %vm4662_vm1, %v4661_v42 }
0x18d5   :  { %v2859_v34 = vmul.f32 %v4640_v61, %v4636_v53  ;;  %4342 = vmatprep.subr.mxu0 %v4661_v42 }
0x18d7   :  { %4330 = vmatmul.mubr.msk.f32.vlgmr.msra.gmra.mrb[40].mxu1 %vm167_vm2, %v2859_v34  ;;  %4335 = vmatmul.mubr.msk.f32.vlgmr.msra.gmra.mrb[24].mxu0 %vm167_vm2, %v3013_v10 }
0x18d8   :  { %4338 = vmatpush3.xpose.msk.msra.mxu1 %vm167_vm2, %v3093_v62  ;;  %4339 = vmatprep.mubr.msk.f32.mxu1 %vm4662_vm1, %v4661_v42 }
0x18d9   :  { %4347 = vmatprep.subr.mxu1 %v4661_v42  ;;  %4344 = vmatprep.mubr.msk.f32.mxu0 %vm4662_vm1, %v4661_v42 }
0x18db   :  { %4340 = vmatmul.mubr.msk.f32.vlgmr.msra.gmra.mrb[42].mxu1 %vm167_vm2, %v3091_v63 }
0x18dc   :  { %4349 = vmatprep.mubr.msk.f32.mxu1 %vm4662_vm1, %v4661_v42 }
0x19a6   :  { %v2932_v2 = vpop.f32.mrb[22].mxu0 }
0x19a7   :  { %v4326_v3 = vpop.f32.mrb[23].mxu0 }
0x19aa   :  { %v3008_v4 = vpop.f32.mrb[40].mxu1  ;;  %v3086_v7 = vpop.f32.mrb[24].mxu0 }
0x19ab   :  { %v3168_v18 = vmul.f32 0.35355338, %v3086_v7  ;;  %v4331_v20 = vpop.f32.mrb[41].mxu1  ;;  %v4336_v22 = vpop.f32.mrb[25].mxu0 }
0x19ad   :  { %v3170_v0 = vsel %vm4808_vm3, %v3168_v18, -1e+30 }
0x19ae   :  { %v3164_v46 = vpop.f32.mrb[42].mxu1  ;;  %v3172_v25 = vsel %vm167_vm2, %v3170_v0, -inf }
0x19af   :  { %v3169_v26 = vmul.f32 0.35355338, %v3164_v46  ;;  %3173 = vmax.xlane.f32.xlu0 %v3172_v25  ;;  %v4341_v14 = vpop.f32.mrb[43].mxu1 }
0x19b1   :  { %v3171_v16 = vsel %vm4808_vm3, %v3169_v26, -1e+30 }
0x19b2   :  { %v3175_v19 = vsel %vm167_vm2, %v3171_v16, -inf }
0x19b3   :  { %3176 = vmax.xlane.f32.xlu1 %v3175_v19 }
0x19c4   :  { %3270 = vrot.lane.b32.xlu1 %v5129_v37, %s4673_s20 }
0x19c8   :  { %4558 = vrot.lane.b32.xlu1 %v4557_v13, %s4674_s21 }
0x19cc   :  { %4563 = vrot.lane.b32.xlu1 %v4562_v12, %s4674_s21 }
0x19d0   :  { %3350 = vrot.lane.b32.xlu1 %v5231_v23, %s4675_s22 }
0x19d4   :  { %3358 = vrot.lane.b32.xlu1 %v3008_v4, %s4676_s23 }
0x1a3c   :  { %v3174_v52 = vpop.xlane.xlu0 %3173 }
0x1a3d   :  { %v3178_v28 = vsub.f32 %v3170_v0, %v3174_v52 }
0x1a3f   :  { %v3180_v33 = vmul.f32 1.442695, %v3178_v28 }
0x1a40   :  { %v3177_v35 = vpop.xlane.xlu1 %3176 }
0x1a41   :  { %4641 = vpow2.f32 %v3180_v33  ;;  %v3179_v37 = vsub.f32 %v3171_v16, %v3177_v35 }
0x1a43   :  { %v3182_v36 = vmul.f32 1.442695, %v3179_v37 }
0x1a44   :  { %v3271_v5 = vpop.permute.xlu1 %3270 }
0x1a45   :  { %4643 = vpow2.f32 %v3182_v36  ;;  %4348 = vmatpush3.msra.mxu1 %v3271_v5  ;;  %v3920_v5 = vld [vmem:[%s5459_s1 + $0x48] sm:$0xff] }
0x1a48   :  { %v4559_v23 = vpop.permute.xlu1 %4558 }
0x1a49   :  { %v4561_v44 = vunpack.i.h.bf16 %v4559_v23  ;;  %v4560_v48 = vunpack.i.l.bf16 %v4559_v23 }
0x1a4b   :  { %v4642_v6 = vpop.eup %4641  ;;  %v4473_v45 = vpack.c.bf16 %v4561_v44, %v4560_v48 }
0x1a4c   :  { %v3184_v38 = vsel %vm167_vm2, %v4642_v6, 0.0  ;;  %v4564_v47 = vpop.permute.xlu1 %4563 }
0x1a4d   :  { %3185 = vadd.xlane.f32.xlu0 %v3184_v38  ;;  %v4566_v11 = vunpack.i.h.bf16 %v4564_v47  ;;  %v4565_v50 = vunpack.i.l.bf16 %v4564_v47 }
0x1a4f   :  { %v4644_v8 = vpop.eup %4643  ;;  %v4477_v53 = vpack.c.bf16 %v4566_v11, %v4565_v50  ;;  %v3510_v11 = vrot.slane %v5116_v24, %v1666_v39  ;;  %v3958_v39 = vld [vmem:[%s5461_s2 + $0x80] sm:$0xff] }
0x1a50   :  { %v3187_v9 = vsel %vm167_vm2, %v4644_v8, 0.0  ;;  %v3351_v62 = vpop.permute.xlu1 %3350 }
0x1a51   :  { %3188 = vadd.xlane.f32.xlu0 %v3187_v9  ;;  %v3371_v7 = vsel %vm167_vm2, %v5189_v17, %v3351_v62  ;;  %v3926_v9 = vld [vmem:[%s5459_s1 + $0x78] sm:$0xff] }
0x1a54   :  { %v3359_v63 = vpop.permute.xlu1 %3358 }
0x1a55   :  { %v3373_v18 = vsel %vm1527_vm5, %v3371_v7, %v3359_v63  ;;  %v3966_v7 = vld [vmem:[%s5461_s2 + $0xc0] sm:$0xff] }
0x1a67   :  { %3194 = vrot.lane.b32.xlu0 %v5131_v41, %s4673_s20 }
0x1a6b   :  { %3348 = vrot.lane.b32.xlu0 %v5229_v21, %s4675_s22 }
0x1a6f   :  { %3356 = vrot.lane.b32.xlu0 %v2932_v2, %s4676_s23 }
0x1ada   :  { %v3186_v12 = vpop.xlane.xlu0 %3185 }
0x1adb   :  { %4645 = vrcp.f32 %v3186_v12 }
0x1ade   :  { %v3189_v43 = vpop.xlane.xlu0 %3188 }
0x1adf   :  { %4647 = vrcp.f32 %v3189_v43 }
0x1ae2   :  { %v3195_v51 = vpop.permute.xlu0 %3194 }
0x1ae3   :  { %4343 = vmatpush3.msra.mxu0 %v3195_v51 }
0x1ae4   :  { %4474 = vmatprep.subr.bf16.mxu0 %v4473_v45 }
0x1ae5   :  { %v4646_v41 = vpop.eup %4645 }
0x1ae6   :  { %v3192_v54 = vmul.f32 %v4646_v41, %v4642_v6  ;;  %v3349_v61 = vpop.permute.xlu0 %3348  ;;  %v3922_v6 = vld [vmem:[%s5459_s1 + $0x58] sm:$0xff]  ;;  %v3516_v41 = vrot.slane %v5116_v24, %v1672_v40  ;;  %v3959_v40 = vld [vmem:[%s5461_s2 + $0x88] sm:$0xff] }
0x1ae7   :  { %v3370_v10 = vsel %vm167_vm2, %v5187_v15, %v3349_v61  ;;  %v3478_v15 = vrot.slane %v5116_v24, %v1634_v32  ;;  %v4481_v38 = vpack.c.bf16 %v3922_v6, %v3920_v5  ;;  %v3961_v61 = vld [vmem:[%s5461_s2 + $0x98] sm:$0xff] }
0x1ae8   :  { %4345 = vmatmul.mubr.msk.f32.vlgmr.msra.gmra.mrb[26].mxu0 %vm167_vm2, %v3192_v54 }
0x1ae9   :  { %v4648_v21 = vpop.eup %4647  ;;  %4476 = vmatpush3.bf16.msra.mxu0 %v4473_v45  ;;  %4482 = vmatprep.subr.bf16.mxu1 %v4481_v38 }
0x1aea   :  { %v3193_v55 = vmul.f32 %v4648_v21, %v4644_v8  ;;  %4478 = vmatprep.subr.bf16.mxu0 %v4477_v53  ;;  %v3357_v34 = vpop.permute.xlu0 %3356  ;;  %v3924_v8 = vld [vmem:[%s5459_s1 + $0x68] sm:$0xff] }
0x1aeb   :  { %v3372_v2 = vsel %vm1527_vm5, %v3370_v10, %v3357_v34  ;;  %v4485_v12 = vpack.c.bf16 %v3926_v9, %v3924_v8  ;;  %v3962_v34 = vld [vmem:[%s5461_s2 + $0xa0] sm:$0xff]  ;;  %v3963_v10 = vld [vmem:[%s5461_s2 + $0xa8] sm:$0xff] }
0x1aec   :  { %4350 = vmatmul.mubr.msk.f32.vlgmr.msra.gmra.mrb[44].mxu1 %vm167_vm2, %v3193_v55  ;;  %v4497_v63 = vpack.c.bf16 %v3963_v10, %v3962_v34  ;;  %v3761_v34 = vld [vmem:[%s5462_s4 + $0x18] sm:$0xff] }
0x1aed   :  { %4480 = vmatpush3.bf16.msra.mxu0 %v4477_v53  ;;  %4484 = vmatpush3.bf16.msra.mxu1 %v4481_v38 }
0x1aee   :  { %4486 = vmatprep.subr.bf16.mxu1 %v4485_v12 }
0x1af1   :  { %4488 = vmatpush3.bf16.msra.mxu1 %v4485_v12 }
0x1bbb   :  { %v3266_v58 = vpop.f32.mrb[26].mxu0 }
0x1bbc   :  { %3364 = vrot.lane.b32.xlu0 %v3266_v58, %s4677_s24  ;;  %v4346_v59 = vpop.f32.mrb[27].mxu0 }
0x1bbf   :  { %v3342_v60 = vpop.f32.mrb[44].mxu1 }
0x1bc0   :  { %3366 = vrot.lane.b32.xlu1 %v3342_v60, %s4677_s24  ;;  %v4351_v30 = vpop.f32.mrb[45].mxu1  ;;  %v4489_v60 = vpack.c.bf16 %v3959_v40, %v3958_v39 }
0x1bc1   :  { %v3960_v30 = vld [vmem:[%s5461_s2 + $0x90] sm:$0xff] }
0x1bc2   :  { %4490 = vmatprep.subr.bf16.mxu0 %v4489_v60  ;;  %v4493_v62 = vpack.c.bf16 %v3961_v61, %v3960_v30 }
0x1c2e   :  { %v3365_v3 = vpop.permute.xlu0 %3364 }
0x1c2f   :  { %v3374_v4 = vsel %vm1530_vm4, %v3372_v2, %v3365_v3  ;;  %v3964_v2 = vld [vmem:[%s5461_s2 + $0xb0] sm:$0xff]  ;;  %v3965_v3 = vld [vmem:[%s5461_s2 + $0xb8] sm:$0xff] }
0x1c30   :  { %4360 = vmatprep.mubr.msk.f32.mxu0 %vm39_vm0, %v3374_v4  ;;  %v4501_v4 = vpack.c.bf16 %v3965_v3, %v3964_v2  ;;  %v3760_v2 = vld [vmem:[%s5462_s4 + $0x10] sm:$0xff] }
0x1c32   :  { %v3367_v20 = vpop.permute.xlu1 %3366 }
0x1c33   :  { %v3375_v22 = vsel %vm1530_vm4, %v3373_v18, %v3367_v20  ;;  %v3967_v18 = vld [vmem:[%s5461_s2 + $0xc8] sm:$0xff]  ;;  %v3968_v20 = vld [vmem:[%s5461_s2 + $0xd0] sm:$0xff] }
0x1c34   :  { %4361 = vmatmul.mubr.msk.f32.vlgmr.msra.gmra.mrb[28].mxu0 %vm39_vm0, %v3375_v22  ;;  %v4505_v22 = vpack.c.bf16 %v3967_v18, %v3966_v7  ;;  %v3765_v7 = vld [vmem:[%s5462_s4 + $0x38] sm:$0xff]  ;;  %v3762_v18 = vld [vmem:[%s5462_s4 + $0x20] sm:$0xff] }
0x1c35   :  { %4492 = vmatpush3.bf16.msra.mxu0 %v4489_v60 }
0x1c36   :  { %4494 = vmatprep.subr.bf16.mxu0 %v4493_v62 }
0x1c39   :  { %4496 = vmatpush3.bf16.msra.mxu0 %v4493_v62  ;;  %v3759_v62 = vld [vmem:[%s5462_s4 + $0x8] sm:$0xff] }
0x1c3a   :  { %4498 = vmatprep.subr.bf16.mxu0 %v4497_v63  ;;  %v4521_v10 = vpack.c.bf16 %v3761_v34, %v3759_v62 }
0x1c3c   :  { %4522 = vmatprep.subr.bf16.mxu1 %v4521_v10 }
0x1c3d   :  { %4500 = vmatpush3.bf16.msra.mxu0 %v4497_v63  ;;  %v3758_v63 = vld [vmem:[%s5462_s4] sm:$0xff] }
0x1c3e   :  { %4502 = vmatprep.subr.bf16.mxu0 %v4501_v4  ;;  %v4523_v3 = vpack.c.bf16 %v3760_v2, %v3758_v63 }
0x1c41   :  { %4504 = vmatpush3.bf16.msra.mxu0 %v4501_v4  ;;  %v3763_v4 = vld [vmem:[%s5462_s4 + $0x28] sm:$0xff] }
0x1c42   :  { %4506 = vmatprep.subr.bf16.mxu0 %v4505_v22 }
0x1c45   :  { %4508 = vmatpush3.bf16.msra.mxu0 %v4505_v22  ;;  %v3764_v22 = vld [vmem:[%s5462_s4 + $0x30] sm:$0xff] }
0x1d07   :  { %v4362_v0 = vpop.f32.mrb[28].mxu0 }
0x1d08   :  { %v3474_v46 = vadd.f32 %v4362_v0, %v5074_v56  ;;  %v3464_v25 = vpop.f32.mrb[29].mxu0 }
0x1d09   :  { %v3473_v26 = vadd.f32 %v3464_v25, %v5076_v57  ;;  %v3971_v25 = vld [vmem:[%s5461_s2 + $0xe8] sm:$0xff] }
0x1d0a   :  { %v5315_v14 = vadd.f32 %v3478_v15, %v3474_v46  ;;  %v3970_v46 = vld [vmem:[%s5461_s2 + $0xe0] sm:$0xff] }
0x1d0b   :  { %v5317_v17 = vadd.f32 %v3478_v15, %v3473_v26  ;;  %v3969_v15 = vld [vmem:[%s5461_s2 + $0xd8] sm:$0xff]  ;;  %v4513_v26 = vpack.c.bf16 %v3971_v25, %v3970_v46 }
0x1d0c   :  { %v3484_v16 = vsel %vm39_vm0, %v5315_v14, 0.0  ;;  %v4509_v0 = vpack.c.bf16 %v3969_v15, %v3968_v20  ;;  %v4525_v20 = vpack.c.bf16 %v3765_v7, %v3763_v4  ;;  %v4527_v15 = vpack.c.bf16 %v3764_v22, %v3762_v18 }
0x1d0d   :  { %3485 = vadd.xlane.f32.xlu1 %v3484_v16  ;;  %v3481_v19 = vsel %vm39_vm0, %v5317_v17, 0.0  ;;  %v3972_v16 = vld [vmem:[%s5461_s2 + $0xf0] sm:$0xff] }
0x1d0e   :  { %3482 = vadd.xlane.f32.xlu0 %v3481_v19  ;;  %4510 = vmatprep.subr.bf16.mxu0 %v4509_v0  ;;  %v3973_v19 = vld [vmem:[%s5461_s2 + $0xf8] sm:$0xff] }
0x1d0f   :  { %4512 = vmatpush3.bf16.msra.mxu0 %v4509_v0 }
0x1d10   :  { %4514 = vmatprep.subr.bf16.mxu0 %v4513_v26 }
0x1d13   :  { %4516 = vmatpush3.bf16.msra.mxu0 %v4513_v26 }
0x1d9a   :  { %v3486_v13 = vpop.xlane.xlu1 %3485 }
0x1d9b   :  { %v3488_v32 = vmul.f32 0.03125, %v3486_v13  ;;  %v3483_v52 = vpop.xlane.xlu0 %3482  ;;  %v4517_v13 = vpack.c.bf16 %v3973_v19, %v3972_v16 }
0x1d9c   :  { %v3487_v28 = vmul.f32 0.03125, %v3483_v52 }
0x1d9d   :  { %v3490_v56 = vsub.f32 %v5315_v14, %v3488_v32  ;;  %4518 = vmatprep.subr.bf16.mxu0 %v4517_v13  ;;  %v3522_v32 = vrot.slane %v5116_v24, %v1678_v1 }
0x1d9e   :  { %v3489_v57 = vsub.f32 %v5317_v17, %v3487_v28  ;;  %4520 = vmatpush3.bf16.msra.mxu0 %v4517_v13 }
0x1d9f   :  { %v3492_v37 = vmul.f32 %v3490_v56, %v3490_v56 }
0x1da0   :  { %v3491_v33 = vmul.f32 %v3489_v57, %v3489_v57 }
0x1da1   :  { %v3496_v36 = vsel %vm39_vm0, %v3492_v37, 0.0 }
0x1da2   :  { %v3493_v35 = vsel %vm39_vm0, %v3491_v33, 0.0 }
0x1da3   :  { %3494 = vadd.xlane.f32.xlu0 %v3493_v35 }
0x1da7   :  { %3497 = vadd.xlane.f32.xlu0 %v3496_v36 }
0x1e30   :  { %v3495_v23 = vpop.xlane.xlu0 %3494 }
0x1e31   :  { %v3499_v44 = vmul.f32 0.03125, %v3495_v23 }
0x1e33   :  { %v3501_v48 = vadd.f32 1e-05, %v3499_v44 }
0x1e34   :  { %v3498_v43 = vpop.xlane.xlu0 %3497 }
0x1e35   :  { %4649 = vrsqrt.f32 %v3501_v48  ;;  %v3500_v45 = vmul.f32 0.03125, %v3498_v43 }
0x1e37   :  { %v3502_v47 = vadd.f32 1e-05, %v3500_v45 }
0x1e39   :  { %4651 = vrsqrt.f32 %v3502_v47 }
0x1e3f   :  { %v4650_v50 = vpop.eup %4649 }
0x1e40   :  { %v3505_v51 = vmul.f32 %v4650_v50, %v3489_v57  ;;  %v3719_v50 = vrot.slane %v5116_v24, %v1874_v49 }
0x1e42   :  { %v3511_v53 = vmul.f32 %v3510_v11, %v3505_v51 }
0x1e43   :  { %v4652_v54 = vpop.eup %4651 }
0x1e44   :  { %v3506_v21 = vmul.f32 %v4652_v54, %v3490_v56  ;;  %v3517_v55 = vadd.f32 %v3516_v41, %v3511_v53 }
0x1e46   :  { %v3512_v58 = vmul.f32 %v3510_v11, %v3506_v21  ;;  %4371 = vmatprep.mubr.msk.f32.mxu1 %vm39_vm0, %v3517_v55 }
0x1e48   :  { %v3518_v59 = vadd.f32 %v3516_v41, %v3512_v58 }
0x1e4a   :  { %4372 = vmatmul.mubr.msk.f32.vlgmr.msra.gmra.mrb[46].mxu1 %vm39_vm0, %v3518_v59 }
0x1e4b   :  { %3847 = vmatprep.mubr.f32.mxu1 %v4661_v42  ;;  %4524 = vmatpush1.bf16.msra.mxu1 %v4523_v3 }
0x1e4c   :  { %4526 = vmatprep.subr.bf16.mxu1 %v4525_v20 }
0x1e4f   :  { %4528 = vmatpush1.bf16.msra.mxu1 %v4527_v15 }
0x1f1d   :  { %v4373_v52 = vpop.f32.mrb[46].mxu1 }
0x1f1e   :  { %v3601_v28 = vadd.f32 %v4373_v52, %v3522_v32  ;;  %v3595_v56 = vpop.f32.mrb[47].mxu1  ;;  %v3722_v52 = vld [vmem:[%s5463_s5] ss:$0 sm:$0xff] }
0x1f1f   :  { %v3596_v57 = vadd.f32 %v3595_v56, %v3522_v32 }
0x1f20   :  { %v3605_v33 = vmul.f32 %v3601_v28, %v3601_v28 }
0x1f21   :  { %v3604_v35 = vmul.f32 %v3596_v57, %v3596_v57 }
0x1f22   :  { %v3607_v37 = vmul.f32 %v3605_v33, %v3601_v28 }
0x1f23   :  { %v3606_v36 = vmul.f32 %v3604_v35, %v3596_v57 }
0x1f24   :  { %v3609_v5 = vmul.f32 0.044715, %v3607_v37 }
0x1f25   :  { %v3608_v6 = vmul.f32 0.044715, %v3606_v36 }
0x1f26   :  { %v3611_v38 = vadd.f32 %v3609_v5, %v3601_v28  ;;  %v3974_v5 = vld [vmem:[%s5463_s5 + $0x2] ss:$8 sm:$0x3] }
0x1f27   :  { %v3610_v8 = vadd.f32 %v3608_v6, %v3596_v57  ;;  %v3770_v6 = vrot.slane %v3974_v5, %v4761_v29  ;;  %v3727_v29 = vld [vmem:[%s5463_s5 + $0x4] ss:$0 sm:$0xff] }
0x1f28   :  { %v3613_v9 = vmul.f32 0.7978846, %v3611_v38 }
0x1f29   :  { %v3612_v12 = vmul.f32 0.7978846, %v3610_v8 }
0x1f2a   :  { %4653 = vtanh.f32 %v3613_v9 }
0x1f2b   :  { %4655 = vtanh.f32 %v3612_v12  ;;  %v3726_v12 = vld [vmem:[%s5463_s5 + $0x3] ss:$0 sm:$0xff] }
0x1f34   :  { %v4654_v23 = vpop.eup %4653 }
0x1f35   :  { %v4656_v44 = vpop.eup %4655  ;;  %v3617_v48 = vadd.f32 1.0, %v4654_v23 }
0x1f36   :  { %v3616_v1 = vadd.f32 1.0, %v4656_v44 }
0x1f37   :  { %v3619_v43 = vmul.f32 0.5, %v3617_v48 }
0x1f38   :  { %v3618_v45 = vmul.f32 0.5, %v3616_v1 }
0x1f39   :  { %v3621_v11 = vmul.f32 %v3619_v43, %v3601_v28 }
0x1f3a   :  { %v3620_v47 = vmul.f32 %v3618_v45, %v3596_v57  ;;  %v3723_v57 = vld [vmem:[%s5463_s5 + $0x1] ss:$0 sm:$0xff] }
0x1f3c   :  { %4406 = vmatprep.mubr.f32.mxu0 %v3620_v47  ;;  %v4678_v47 = vmov 0  }
0x1f3d   :  { %4407 = vmatmul.mubr.f32.vlgmr.msra.gmra.mrb[30].mxu0 %v3621_v11  ;;  %4567 = vset.pattern.permute.xlu0 %v4678_v47 }
0x1f3e   :  { %4568 = vset.pattern.permute.xlu1 %v4678_v47 }
0x2010   :  { %v4408_v51 = vpop.f32.mrb[30].mxu0 }
0x2011   :  { %v3715_v41 = vadd.f32 %v4408_v51, %v5315_v14  ;;  %v3705_v53 = vpop.f32.mrb[31].mxu0 }
0x2012   :  { %v3714_v54 = vadd.f32 %v3705_v53, %v5317_v17  ;;  %v3774_v53 = vrot.slane %v3974_v5, %v4769_v31 }
0x2013   :  { %v3721_v21 = vadd.f32 %v3719_v50, %v3715_v41 }
0x2014   :  { %v3720_v55 = vadd.f32 %v3719_v50, %v3714_v54 }
0x2015   :  { %v3731_v58 = vsel %vm39_vm0, %v3721_v21, 0.0 }
0x2016   :  { %3732 = vadd.xlane.f32.xlu1 %v3731_v58  ;;  %v3728_v59 = vsel %vm39_vm0, %v3720_v55, 0.0 }
0x2017   :  { %3729 = vadd.xlane.f32.xlu0 %v3728_v59 }
0x20a3   :  { %v3733_v39 = vpop.xlane.xlu1 %3732 }
0x20a4   :  { %v3735_v40 = vmul.f32 0.03125, %v3733_v39  ;;  %v3730_v60 = vpop.xlane.xlu0 %3729 }
0x20a5   :  { %v3734_v27 = vmul.f32 0.03125, %v3730_v60 }
0x20a6   :  { %v3737_v30 = vsub.f32 %v3721_v21, %v3735_v40 }
0x20a7   :  { %v3736_v49 = vsub.f32 %v3720_v55, %v3734_v27 }
0x20a8   :  { %v3739_v24 = vmul.f32 %v3737_v30, %v3737_v30 }
0x20a9   :  { %v3738_v61 = vmul.f32 %v3736_v49, %v3736_v49 }
0x20aa   :  { %v3743_v14 = vsel %vm39_vm0, %v3739_v24, 0.0 }
0x20ab   :  { %3744 = vadd.xlane.f32.xlu1 %v3743_v14  ;;  %v3740_v17 = vsel %vm39_vm0, %v3738_v61, 0.0 }
0x20ac   :  { %3741 = vadd.xlane.f32.xlu0 %v3740_v17 }
0x2138   :  { %v3745_v0 = vpop.xlane.xlu1 %3744 }
0x2139   :  { %v3747_v46 = vmul.f32 0.03125, %v3745_v0  ;;  %v3742_v25 = vpop.xlane.xlu0 %3741 }
0x213a   :  { %v3746_v26 = vmul.f32 0.03125, %v3742_v25 }
0x213b   :  { %v3749_v16 = vadd.f32 1e-05, %v3747_v46 }
0x213c   :  { %v3748_v19 = vadd.f32 1e-05, %v3746_v26 }
0x213d   :  { %4657 = vrsqrt.f32 %v3749_v16 }
0x213e   :  { %4659 = vrsqrt.f32 %v3748_v19 }
0x2147   :  { %v4658_v13 = vpop.eup %4657 }
0x2148   :  { %v4660_v32 = vpop.eup %4659  ;;  %v3753_v56 = vmul.f32 %v4658_v13, %v3737_v30 }
0x2149   :  { %v3752_v28 = vmul.f32 %v4660_v32, %v3736_v49 }
0x214a   :  { %v3755_v37 = vmul.f32 %v3753_v56, %v3722_v52 }
0x214b   :  { %v3754_v33 = vmul.f32 %v3752_v28, %v3722_v52 }
0x214c   :  { %v3757_v36 = vadd.f32 %v3755_v37, %v3723_v57 }
0x214d   :  { %v3756_v35 = vadd.f32 %v3754_v33, %v3723_v57 }
0x214f   :  { %3975 = vmatmul.mubr.msk.f32.vlgmr.msra.gmra.mrb[48].mxu1 %vm39_vm0, %v3756_v35 }
0x2150   :  { %3853 = vmatprep.mubr.f32.mxu1 %v4661_v42 }
0x2153   :  { %3976 = vmatmul.mubr.msk.f32.gmra.mrb[50].mxu1 %vm39_vm0, %v3757_v36 }
0x2222   :  { %v3849_v38 = vpop.f32.mrb[48].mxu1 }
0x2223   :  { %v3850_v8 = vadd.f32 %v3849_v38, %v3770_v6  ;;  %v3851_v9 = vpop.f32.mrb[49].mxu1 }
0x2224   :  { %v3852_v54 = vadd.f32 %v3851_v9, %v3774_v53 }
0x2225   :  { %v3860_v23 = vmax.f32 %v3850_v8, 0.0 }
0x2226   :  { %v3855_v44 = vpop.f32.mrb[50].mxu1 }
0x2227   :  { %v3862_v48 = vmul.f32 %v3860_v23, %v3726_v12  ;;  %v3856_v42 = vadd.f32 %v3855_v44, %v3770_v6  ;;  %v3857_v1 = vpop.f32.mrb[51].mxu1 }
0x2228   :  { %v3858_v58 = vadd.f32 %v3857_v1, %v3774_v53 }
0x2229   :  { %v3861_v43 = vmax.f32 %v3856_v42, 0.0  ;;  %3864 = vadd.xlane.f32.xlu0 %v3862_v48 }
0x222b   :  { %v3863_v45 = vmul.f32 %v3861_v43, %v3726_v12 }
0x222d   :  { %3866 = vadd.xlane.f32.xlu1 %v3863_v45 }
0x22b6   :  { %v3865_v11 = vpop.xlane.xlu0 %3864 }
0x22b7   :  { %v3868_v50 = vadd.f32 %v3865_v11, %v3727_v29 }
0x22b9   :  { %3872 = vperm.xlu0 %4567, %v3868_v50  }
0x22ba   :  { %v3867_v51 = vpop.xlane.xlu1 %3866 }
0x22bb   :  { %v3869_v41 = vadd.f32 %v3867_v51, %v3727_v29 }
0x22bd   :  { %3877 = vperm.xlu1 %4568, %v3869_v41  }
0x2338   :  { %v3873_v21 = vpop.permute.xlu0 %3872 }
0x2339   :  { %v3881_v55 = vsel %vm3880_vm6, %v3852_v54, %v3873_v21 }
0x233a   :  { %3883 = vst [vmem:[%s5464_s6] sm:$0xff] %v3881_v55 }
0x233c   :  { %v3878_v59 = vpop.permute.xlu1 %3877 }
0x233d   :  { %v3882_v39 = vsel %vm3880_vm6, %v3858_v58, %v3878_v59 }
0x233e   :  { %3884 = vst [vmem:[%s5464_s6 + $0x8] sm:$0xff] %v3882_v39 }

</bundles_post_ra>
